<compile_context>
chip_gen: v5e
topology: v5e:2x2
jax: 0.10.0
libtpu: 0.0.40
codegen_flags: <defaults>
</compile_context>

<pallas_src>
import jax
import jax.numpy as jnp
from jax.experimental import pallas as pl
from jax.experimental.pallas import tpu as pltpu

EPS = 1e-5  # torch.nn.BatchNorm2d default eps


def _pack_conv3x3_row_matrices(w_hwio, width):
    """Fold a 3x3, padding=1 conv into 3 lane-dense 'row matmul' matrices.

    Returns m of shape (3, width*ci, width*co) such that, for an input row laid out
    lane-dense as x_row[jc*ci + c] = x[..., col=jc, chan=c]:

        y[i, j*co + o] = sum_kh  x_row(i + kh - 1) @ m[kh]

    i.e. m[kh][(j+kw-1)*ci + c, j*co + o] = w_hwio[kh, kw, c, o]; the out-of-range
    diagonal blocks (the zero column padding) are simply dropped.
    """
    _, _, ci, co = w_hwio.shape
    eye = jnp.eye(width, dtype=jnp.float32)
    mats = []
    for kh in range(3):
        m = jnp.zeros((width * ci, width * co), jnp.float32)
        for kw in range(3):
            blk = jnp.kron(eye, w_hwio[kh, kw].astype(jnp.float32))  # (W*ci, W*co)
            s = (kw - 1) * ci  # input column jc = j + (kw - 1)
            if s == 0:
                m = m + blk
            elif s > 0:
                m = m.at[s:, :].add(blk[:-s, :])
            else:
                m = m.at[:s, :].add(blk[-s:, :])
        mats.append(m)
    return jnp.stack(mats, axis=0)


def _channel_tile_matrix(c, width):
    """(c, width*c) 0/1 matrix T with T[a, j*c + b] = (a == b).

    Reduces per-(col, chan) lane statistics to per-channel values (contraction) and
    re-broadcasts per-channel scale/shift back to the flattened lane axis (matmul)
    -- both on the MXU instead of lane<->sublane relayouts."""
    return jnp.tile(jnp.eye(c, dtype=jnp.float32), (1, width))


def _make_double_conv3_kernel(n, h, w, cin, cmid, cout):
    """Build the fused kernel closure for static shapes (n, h, w, cin, cmid, cout)."""

    def bn_scale_shift(h_list, gamma, beta, t):
        """Training-mode BatchNorm folded to lane-dense scale/shift (f32).

        h_list: per-batch (h, w*c) post-ReLU activations (VMEM values).
        gamma/beta: (1, c).  t: (c, w*c) channel tiling matrix.
        Returns scale, shift of shape (1, w*c)."""
        inv_count = 1.0 / float(n * h * w)
        s_lane = h_list[0].sum(axis=0, keepdims=True)                  # (1, w*c)
        for hb in h_list[1:]:
            s_lane = s_lane + hb.sum(axis=0, keepdims=True)
        mean_c = jax.lax.dot_general(                                  # (1, c)
            s_lane, t, (((1,), (1,)), ((), ())),
            preferred_element_type=jnp.float32) * inv_count
        mean_lane = jnp.dot(mean_c, t, preferred_element_type=jnp.float32)
        # Two-pass (shifted) variance to avoid E[x^2]-E[x]^2 cancellation.
        v_lane = ((h_list[0] - mean_lane) ** 2).sum(axis=0, keepdims=True)
        for hb in h_list[1:]:
            v_lane = v_lane + ((hb - mean_lane) ** 2).sum(axis=0, keepdims=True)
        var_c = jax.lax.dot_general(                                   # (1, c)
            v_lane, t, (((1,), (1,)), ((), ())),
            preferred_element_type=jnp.float32) * inv_count
        scale_c = gamma * jax.lax.rsqrt(var_c + EPS)                   # (1, c)
        shift_c = beta - mean_c * scale_c
        scale = jnp.dot(scale_c, t, preferred_element_type=jnp.float32)
        shift = jnp.dot(shift_c, t, preferred_element_type=jnp.float32)
        return scale, shift

    def kernel(x_ref, w1_ref, w2_ref, g1_ref, b1_ref, g2_ref, b2_ref,
               t1_ref, t2_ref, y_ref, h1pad_ref):
        # x_ref:      (n, h+2, w*cin)     row-padded, lane-dense input
        # w1_ref:     (3, w*cin, w*cmid)  packed conv1 row matrices
        # w2_ref:     (3, w*cmid, w*cout) packed conv2 row matrices
        # g*/b*_ref:  (1, c)              BN affine params
        # t1/t2_ref:  (c, w*c)            channel tiling matrices
        # y_ref:      (n*h, w*cout)       lane-dense output
        # h1pad_ref:  (n, h+2, w*cmid)    VMEM scratch: row-padded BN1(ReLU(conv1))

        # ----- Layer 1: conv3x3 as 3 per-kh lane-dense MXU matmuls, then ReLU -----
        h1 = []
        for nb in range(n):
            acc = jnp.zeros((h, w * cmid), jnp.float32)
            for kh in range(3):
                acc = acc + jnp.dot(x_ref[nb, kh:kh + h, :], w1_ref[kh],
                                    preferred_element_type=jnp.float32)
            h1.append(jnp.maximum(acc, 0.0))

        # ----- BN1: exact batch statistics (whole tensor is VMEM-resident) -----
        scale1, shift1 = bn_scale_shift(h1, g1_ref[...], b1_ref[...], t1_ref[...])

        # Apply BN1 and stage into the row-padded scratch (halo rows stay zero);
        # the intermediate activation never leaves VMEM.
        h1pad_ref[...] = jnp.zeros_like(h1pad_ref)
        for nb in range(n):
            h1pad_ref[nb, 1:h + 1, :] = h1[nb] * scale1 + shift1

        # ----- Layer 2: conv3x3 + ReLU -----
        h2 = []
        for nb in range(n):
            acc = jnp.zeros((h, w * cout), jnp.float32)
            for kh in range(3):
                acc = acc + jnp.dot(h1pad_ref[nb, kh:kh + h, :], w2_ref[kh],
                                    preferred_element_type=jnp.float32)
            h2.append(jnp.maximum(acc, 0.0))

        # ----- BN2 + lane-dense (full-width) output stores -----
        scale2, shift2 = bn_scale_shift(h2, g2_ref[...], b2_ref[...], t2_ref[...])
        for nb in range(n):
            y_ref[nb * h:(nb + 1) * h, :] = h2[nb] * scale2 + shift2

    return kernel


def double_conv3_forward(x_nchw, params):
    """DoubleConv3.forward: (conv3x3 -> ReLU -> BN) twice.  NCHW in / NCHW out."""
    w1, g1, b1, w2, g2, b2 = params
    n, cin, h, w = x_nchw.shape
    cmid, cout = w1.shape[0], w2.shape[0]

    # Lane-dense activation layout: (batch, row, (col, chan) flattened), plus two
    # zero halo rows for the kh taps.  No column padding is materialized -- it is
    # folded into the packed conv matrices.
    x_rows = jnp.transpose(x_nchw, (0, 2, 3, 1)).astype(jnp.float32)
    x_rows = x_rows.reshape(n, h, w * cin)
    x_pad = jnp.pad(x_rows, ((0, 0), (1, 1), (0, 0)))

    w1_k = _pack_conv3x3_row_matrices(
        jnp.transpose(w1, (2, 3, 1, 0)).astype(jnp.float32), w)  # (3, w*cin, w*cmid)
    w2_k = _pack_conv3x3_row_matrices(
        jnp.transpose(w2, (2, 3, 1, 0)).astype(jnp.float32), w)  # (3, w*cmid, w*cout)
    t1 = _channel_tile_matrix(cmid, w)
    t2 = _channel_tile_matrix(cout, w)

    g1r = g1.reshape(1, cmid).astype(jnp.float32)
    b1r = b1.reshape(1, cmid).astype(jnp.float32)
    g2r = g2.reshape(1, cout).astype(jnp.float32)
    b2r = b2.reshape(1, cout).astype(jnp.float32)

    # Fused single-kernel path: inputs, packed weights, the intermediate activation
    # and the output all live in VMEM for the single grid step.
    vmem_bytes = 4 * (x_pad.size + w1_k.size + w2_k.size + t1.size + t2.size
                      + n * (h + 2) * w * cmid                 # h1 scratch
                      + 2 * n * h * w * max(cmid, cout)        # live activation values
                      + n * h * w * cout)                      # output
    assert vmem_bytes < 48 * 1024 * 1024, (
        "fused DoubleConv3 kernel is sized for small UNet blocks; got "
        f"{vmem_bytes / 2**20:.1f} MiB")  # TODO(synk): tiled fallback for big shapes

    kernel = _make_double_conv3_kernel(n, h, w, cin, cmid, cout)

    y_rows = pl.pallas_call(
        kernel,
        grid=(1,),
        in_specs=[
            pl.BlockSpec((n, h + 2, w * cin), lambda i: (0, 0, 0)),
            pl.BlockSpec((3, w * cin, w * cmid), lambda i: (0, 0, 0)),
            pl.BlockSpec((3, w * cmid, w * cout), lambda i: (0, 0, 0)),
            pl.BlockSpec((1, cmid), lambda i: (0, 0)),
            pl.BlockSpec((1, cmid), lambda i: (0, 0)),
            pl.BlockSpec((1, cout), lambda i: (0, 0)),
            pl.BlockSpec((1, cout), lambda i: (0, 0)),
            pl.BlockSpec((cmid, w * cmid), lambda i: (0, 0)),
            pl.BlockSpec((cout, w * cout), lambda i: (0, 0)),
        ],
        out_specs=pl.BlockSpec((n * h, w * cout), lambda i: (0, 0)),
        out_shape=jax.ShapeDtypeStruct((n * h, w * cout), jnp.float32),
        scratch_shapes=[pltpu.VMEM((n, h + 2, w * cmid), jnp.float32)],
        compiler_params=pltpu.CompilerParams(
            dimension_semantics=("arbitrary",),
        ),
    )(x_pad, w1_k, w2_k, g1r, b1r, g2r, b2r, t1, t2)

    y = y_rows.reshape(n, h, w, cout)
    return jnp.transpose(y, (0, 3, 1, 2))


def ref_forward(x, params):
    """Pure-JAX reference (same semantics as the torch module in train mode)."""
    w1, g1, b1, w2, g2, b2 = params

    def conv(x, w):
        return jax.lax.conv_general_dilated(
            x, w, window_strides=(1, 1), padding=((1, 1), (1, 1)),
            dimension_numbers=("NCHW", "OIHW", "NCHW"))

    def bn(x, g, b):
        m = jnp.mean(x, axis=(0, 2, 3), keepdims=True)
        v = jnp.mean((x - m) ** 2, axis=(0, 2, 3), keepdims=True)
        return (x - m) * jax.lax.rsqrt(v + EPS) * g.reshape(1, -1, 1, 1) \
            + b.reshape(1, -1, 1, 1)

    hmid = bn(jnp.maximum(conv(x, w1), 0.0), g1, b1)
    return bn(jnp.maximum(conv(hmid, w2), 0.0), g2, b2)


if __name__ == "__main__":
    # DoubleConv3(in_channels=4, out_channels=8) -> mid_channels = 8
    N, Cin, Cmid, Cout, H, W = 2, 4, 8, 8, 16, 16
    ks = jax.random.split(jax.random.PRNGKey(0), 7)
    x = jax.random.normal(ks[0], (N, Cin, H, W), jnp.float32)
    # Conv2d weights (OIHW, bias=False); BN affine params perturbed from the torch
    # defaults (1/0) so the scale/shift path is actually exercised.
    w1 = 0.1 * jax.random.normal(ks[1], (Cmid, Cin, 3, 3), jnp.float32)
    g1 = 1.0 + 0.1 * jax.random.normal(ks[2], (Cmid,), jnp.float32)
    b1 = 0.1 * jax.random.normal(ks[3], (Cmid,), jnp.float32)
    w2 = 0.1 * jax.random.normal(ks[4], (Cout, Cmid, 3, 3), jnp.float32)
    g2 = 1.0 + 0.1 * jax.random.normal(ks[5], (Cout,), jnp.float32)
    b2 = 0.1 * jax.random.normal(ks[6], (Cout,), jnp.float32)
    params = (w1, g1, b1, w2, g2, b2)

    out = jax.jit(double_conv3_forward)(x, params)
    out = jax.block_until_ready(out)

    ref = ref_forward(x, params)
    assert out.shape == (N, Cout, H, W), out.shape
    max_err = float(jnp.max(jnp.abs(out - ref)))
    assert jnp.allclose(out, ref, rtol=1e-4, atol=1e-4), f"max abs err {max_err}"
    print("KERNEL_OK")
</pallas_src>

<mosaic_0001>
module attributes {stable_mosaic.version = 11 : i64} {
  func.func @kernel(%arg0: i32, %arg1: memref<2x18x64xf32, #tpu.memory_space<vmem>>, %arg2: memref<3x64x128xf32, #tpu.memory_space<vmem>>, %arg3: memref<3x128x128xf32, #tpu.memory_space<vmem>>, %arg4: memref<1x8xf32, #tpu.memory_space<vmem>>, %arg5: memref<1x8xf32, #tpu.memory_space<vmem>>, %arg6: memref<1x8xf32, #tpu.memory_space<vmem>>, %arg7: memref<1x8xf32, #tpu.memory_space<vmem>>, %arg8: memref<8x128xf32, #tpu.memory_space<vmem>>, %arg9: memref<8x128xf32, #tpu.memory_space<vmem>>, %arg10: memref<32x128xf32, #tpu.memory_space<vmem>>, %arg11: memref<2x18x128xf32, #tpu.memory_space<vmem>>) attributes {dimension_semantics = [#tpu.dimension_semantics<arbitrary>], iteration_bounds = array<i64: 1>, scalar_prefetch = 0 : i64, scratch_operands = 1 : i64, tpu.core_type = #tpu.core_type<tc>, window_params = [{pipeline_mode = #tpu.pipeline_mode<synchronous>, transform_indices = @transform_0, window_bounds = array<i64: 2, 18, 64>}, {pipeline_mode = #tpu.pipeline_mode<synchronous>, transform_indices = @transform_1, window_bounds = array<i64: 3, 64, 128>}, {pipeline_mode = #tpu.pipeline_mode<synchronous>, transform_indices = @transform_2, window_bounds = array<i64: 3, 128, 128>}, {pipeline_mode = #tpu.pipeline_mode<synchronous>, transform_indices = @transform_3, window_bounds = array<i64: 1, 8>}, {pipeline_mode = #tpu.pipeline_mode<synchronous>, transform_indices = @transform_4, window_bounds = array<i64: 1, 8>}, {pipeline_mode = #tpu.pipeline_mode<synchronous>, transform_indices = @transform_5, window_bounds = array<i64: 1, 8>}, {pipeline_mode = #tpu.pipeline_mode<synchronous>, transform_indices = @transform_6, window_bounds = array<i64: 1, 8>}, {pipeline_mode = #tpu.pipeline_mode<synchronous>, transform_indices = @transform_7, window_bounds = array<i64: 8, 128>}, {pipeline_mode = #tpu.pipeline_mode<synchronous>, transform_indices = @transform_8, window_bounds = array<i64: 8, 128>}, {pipeline_mode = #tpu.pipeline_mode<synchronous>, transform_indices = @transform_9, window_bounds = array<i64: 32, 128>}]} {
    %cst = arith.constant 0.000000e+00 : f32
    %0 = vector.broadcast %cst : f32 to vector<16x128xf32>
    %c0 = arith.constant 0 : index
    %c0_0 = arith.constant 0 : index
    %c0_1 = arith.constant 0 : index
    %1 = vector.load %arg1[%c0, %c0_0, %c0_1] : memref<2x18x64xf32, #tpu.memory_space<vmem>>, vector<1x16x64xf32>
    %2 = vector.shape_cast %1 : vector<1x16x64xf32> to vector<16x64xf32>
    %c0_2 = arith.constant 0 : index
    %c0_3 = arith.constant 0 : index
    %c0_4 = arith.constant 0 : index
    %3 = vector.load %arg2[%c0_2, %c0_3, %c0_4] : memref<3x64x128xf32, #tpu.memory_space<vmem>>, vector<1x64x128xf32>
    %4 = vector.shape_cast %3 : vector<1x64x128xf32> to vector<64x128xf32>
    %cst_5 = arith.constant dense<0.000000e+00> : vector<16x128xf32>
    %5 = tpu.matmul %2, %4, %cst_5 {dimension_numbers = #tpu.dot_dimension_numbers<[1], [0], [0], [1], [0, 0, 1, 1], [], []>} : vector<16x64xf32>, vector<64x128xf32>, vector<16x128xf32> -> vector<16x128xf32>
    %6 = arith.addf %0, %5 : vector<16x128xf32>
    %c0_6 = arith.constant 0 : index
    %c1 = arith.constant 1 : index
    %c0_7 = arith.constant 0 : index
    %7 = vector.load %arg1[%c0_6, %c1, %c0_7] : memref<2x18x64xf32, #tpu.memory_space<vmem>>, vector<1x16x64xf32>
    %8 = vector.shape_cast %7 : vector<1x16x64xf32> to vector<16x64xf32>
    %c1_8 = arith.constant 1 : index
    %c0_9 = arith.constant 0 : index
    %c0_10 = arith.constant 0 : index
    %9 = vector.load %arg2[%c1_8, %c0_9, %c0_10] : memref<3x64x128xf32, #tpu.memory_space<vmem>>, vector<1x64x128xf32>
    %10 = vector.shape_cast %9 : vector<1x64x128xf32> to vector<64x128xf32>
    %cst_11 = arith.constant dense<0.000000e+00> : vector<16x128xf32>
    %11 = tpu.matmul %8, %10, %cst_11 {dimension_numbers = #tpu.dot_dimension_numbers<[1], [0], [0], [1], [0, 0, 1, 1], [], []>} : vector<16x64xf32>, vector<64x128xf32>, vector<16x128xf32> -> vector<16x128xf32>
    %12 = arith.addf %6, %11 : vector<16x128xf32>
    %c0_12 = arith.constant 0 : index
    %c2 = arith.constant 2 : index
    %c0_13 = arith.constant 0 : index
    %13 = vector.load %arg1[%c0_12, %c2, %c0_13] : memref<2x18x64xf32, #tpu.memory_space<vmem>>, vector<1x16x64xf32>
    %14 = vector.shape_cast %13 : vector<1x16x64xf32> to vector<16x64xf32>
    %c2_14 = arith.constant 2 : index
    %c0_15 = arith.constant 0 : index
    %c0_16 = arith.constant 0 : index
    %15 = vector.load %arg2[%c2_14, %c0_15, %c0_16] : memref<3x64x128xf32, #tpu.memory_space<vmem>>, vector<1x64x128xf32>
    %16 = vector.shape_cast %15 : vector<1x64x128xf32> to vector<64x128xf32>
    %cst_17 = arith.constant dense<0.000000e+00> : vector<16x128xf32>
    %17 = tpu.matmul %14, %16, %cst_17 {dimension_numbers = #tpu.dot_dimension_numbers<[1], [0], [0], [1], [0, 0, 1, 1], [], []>} : vector<16x64xf32>, vector<64x128xf32>, vector<16x128xf32> -> vector<16x128xf32>
    %18 = arith.addf %12, %17 : vector<16x128xf32>
    %cst_18 = arith.constant 0.000000e+00 : f32
    %19 = vector.broadcast %cst_18 : f32 to vector<16x128xf32>
    %20 = arith.maximumf %18, %19 : vector<16x128xf32>
    %cst_19 = arith.constant 0.000000e+00 : f32
    %21 = vector.broadcast %cst_19 : f32 to vector<16x128xf32>
    %c1_20 = arith.constant 1 : index
    %c0_21 = arith.constant 0 : index
    %c0_22 = arith.constant 0 : index
    %22 = vector.load %arg1[%c1_20, %c0_21, %c0_22] : memref<2x18x64xf32, #tpu.memory_space<vmem>>, vector<1x16x64xf32>
    %23 = vector.shape_cast %22 : vector<1x16x64xf32> to vector<16x64xf32>
    %c0_23 = arith.constant 0 : index
    %c0_24 = arith.constant 0 : index
    %c0_25 = arith.constant 0 : index
    %24 = vector.load %arg2[%c0_23, %c0_24, %c0_25] : memref<3x64x128xf32, #tpu.memory_space<vmem>>, vector<1x64x128xf32>
    %25 = vector.shape_cast %24 : vector<1x64x128xf32> to vector<64x128xf32>
    %cst_26 = arith.constant dense<0.000000e+00> : vector<16x128xf32>
    %26 = tpu.matmul %23, %25, %cst_26 {dimension_numbers = #tpu.dot_dimension_numbers<[1], [0], [0], [1], [0, 0, 1, 1], [], []>} : vector<16x64xf32>, vector<64x128xf32>, vector<16x128xf32> -> vector<16x128xf32>
    %27 = arith.addf %21, %26 : vector<16x128xf32>
    %c1_27 = arith.constant 1 : index
    %c1_28 = arith.constant 1 : index
    %c0_29 = arith.constant 0 : index
    %28 = vector.load %arg1[%c1_27, %c1_28, %c0_29] : memref<2x18x64xf32, #tpu.memory_space<vmem>>, vector<1x16x64xf32>
    %29 = vector.shape_cast %28 : vector<1x16x64xf32> to vector<16x64xf32>
    %c1_30 = arith.constant 1 : index
    %c0_31 = arith.constant 0 : index
    %c0_32 = arith.constant 0 : index
    %30 = vector.load %arg2[%c1_30, %c0_31, %c0_32] : memref<3x64x128xf32, #tpu.memory_space<vmem>>, vector<1x64x128xf32>
    %31 = vector.shape_cast %30 : vector<1x64x128xf32> to vector<64x128xf32>
    %cst_33 = arith.constant dense<0.000000e+00> : vector<16x128xf32>
    %32 = tpu.matmul %29, %31, %cst_33 {dimension_numbers = #tpu.dot_dimension_numbers<[1], [0], [0], [1], [0, 0, 1, 1], [], []>} : vector<16x64xf32>, vector<64x128xf32>, vector<16x128xf32> -> vector<16x128xf32>
    %33 = arith.addf %27, %32 : vector<16x128xf32>
    %c1_34 = arith.constant 1 : index
    %c2_35 = arith.constant 2 : index
    %c0_36 = arith.constant 0 : index
    %34 = vector.load %arg1[%c1_34, %c2_35, %c0_36] : memref<2x18x64xf32, #tpu.memory_space<vmem>>, vector<1x16x64xf32>
    %35 = vector.shape_cast %34 : vector<1x16x64xf32> to vector<16x64xf32>
    %c2_37 = arith.constant 2 : index
    %c0_38 = arith.constant 0 : index
    %c0_39 = arith.constant 0 : index
    %36 = vector.load %arg2[%c2_37, %c0_38, %c0_39] : memref<3x64x128xf32, #tpu.memory_space<vmem>>, vector<1x64x128xf32>
    %37 = vector.shape_cast %36 : vector<1x64x128xf32> to vector<64x128xf32>
    %cst_40 = arith.constant dense<0.000000e+00> : vector<16x128xf32>
    %38 = tpu.matmul %35, %37, %cst_40 {dimension_numbers = #tpu.dot_dimension_numbers<[1], [0], [0], [1], [0, 0, 1, 1], [], []>} : vector<16x64xf32>, vector<64x128xf32>, vector<16x128xf32> -> vector<16x128xf32>
    %39 = arith.addf %33, %38 : vector<16x128xf32>
    %cst_41 = arith.constant 0.000000e+00 : f32
    %40 = vector.broadcast %cst_41 : f32 to vector<16x128xf32>
    %41 = arith.maximumf %39, %40 : vector<16x128xf32>
    %c0_42 = arith.constant 0 : index
    %c0_43 = arith.constant 0 : index
    %42 = vector.load %arg4[%c0_42, %c0_43] : memref<1x8xf32, #tpu.memory_space<vmem>>, vector<1x8xf32>
    %c0_44 = arith.constant 0 : index
    %c0_45 = arith.constant 0 : index
    %43 = vector.load %arg5[%c0_44, %c0_45] : memref<1x8xf32, #tpu.memory_space<vmem>>, vector<1x8xf32>
    %c0_46 = arith.constant 0 : index
    %c0_47 = arith.constant 0 : index
    %44 = vector.load %arg8[%c0_46, %c0_47] : memref<8x128xf32, #tpu.memory_space<vmem>>, vector<8x128xf32>
    %cst_48 = arith.constant dense<0.000000e+00> : vector<128xf32>
    %45 = vector.multi_reduction <add>, %20, %cst_48 [0] : vector<16x128xf32> to vector<128xf32>
    %46 = vector.shape_cast %45 : vector<128xf32> to vector<1x128xf32>
    %cst_49 = arith.constant dense<0.000000e+00> : vector<128xf32>
    %47 = vector.multi_reduction <add>, %41, %cst_49 [0] : vector<16x128xf32> to vector<128xf32>
    %48 = vector.shape_cast %47 : vector<128xf32> to vector<1x128xf32>
    %49 = arith.addf %46, %48 : vector<1x128xf32>
    %cst_50 = arith.constant dense<0.000000e+00> : vector<1x8xf32>
    %50 = tpu.matmul %49, %44, %cst_50 {dimension_numbers = #tpu.dot_dimension_numbers<[1], [1], [0], [0], [0, 0, 1, 0], [], []>} : vector<1x128xf32>, vector<8x128xf32>, vector<1x8xf32> -> vector<1x8xf32>
    %cst_51 = arith.constant 0.001953125 : f32
    %51 = vector.broadcast %cst_51 : f32 to vector<1x8xf32>
    %52 = arith.mulf %50, %51 : vector<1x8xf32>
    %cst_52 = arith.constant dense<0.000000e+00> : vector<1x128xf32>
    %53 = tpu.matmul %52, %44, %cst_52 {dimension_numbers = #tpu.dot_dimension_numbers<[1], [0], [0], [1], [0, 0, 1, 1], [], []>} : vector<1x8xf32>, vector<8x128xf32>, vector<1x128xf32> -> vector<1x128xf32>
    %54 = vector.broadcast %53 : vector<1x128xf32> to vector<16x128xf32>
    %55 = arith.subf %20, %54 : vector<16x128xf32>
    %56 = arith.mulf %55, %55 : vector<16x128xf32>
    %cst_53 = arith.constant dense<0.000000e+00> : vector<128xf32>
    %57 = vector.multi_reduction <add>, %56, %cst_53 [0] : vector<16x128xf32> to vector<128xf32>
    %58 = vector.shape_cast %57 : vector<128xf32> to vector<1x128xf32>
    %59 = vector.broadcast %53 : vector<1x128xf32> to vector<16x128xf32>
    %60 = arith.subf %41, %59 : vector<16x128xf32>
    %61 = arith.mulf %60, %60 : vector<16x128xf32>
    %cst_54 = arith.constant dense<0.000000e+00> : vector<128xf32>
    %62 = vector.multi_reduction <add>, %61, %cst_54 [0] : vector<16x128xf32> to vector<128xf32>
    %63 = vector.shape_cast %62 : vector<128xf32> to vector<1x128xf32>
    %64 = arith.addf %58, %63 : vector<1x128xf32>
    %cst_55 = arith.constant dense<0.000000e+00> : vector<1x8xf32>
    %65 = tpu.matmul %64, %44, %cst_55 {dimension_numbers = #tpu.dot_dimension_numbers<[1], [1], [0], [0], [0, 0, 1, 0], [], []>} : vector<1x128xf32>, vector<8x128xf32>, vector<1x8xf32> -> vector<1x8xf32>
    %cst_56 = arith.constant 0.001953125 : f32
    %66 = vector.broadcast %cst_56 : f32 to vector<1x8xf32>
    %67 = arith.mulf %65, %66 : vector<1x8xf32>
    %cst_57 = arith.constant 9.99999974E-6 : f32
    %68 = vector.broadcast %cst_57 : f32 to vector<1x8xf32>
    %69 = arith.addf %67, %68 : vector<1x8xf32>
    %70 = math.rsqrt %69 : vector<1x8xf32>
    %71 = arith.mulf %42, %70 : vector<1x8xf32>
    %72 = arith.mulf %52, %71 : vector<1x8xf32>
    %73 = arith.subf %43, %72 : vector<1x8xf32>
    %cst_58 = arith.constant dense<0.000000e+00> : vector<1x128xf32>
    %74 = tpu.matmul %71, %44, %cst_58 {dimension_numbers = #tpu.dot_dimension_numbers<[1], [0], [0], [1], [0, 0, 1, 1], [], []>} : vector<1x8xf32>, vector<8x128xf32>, vector<1x128xf32> -> vector<1x128xf32>
    %cst_59 = arith.constant dense<0.000000e+00> : vector<1x128xf32>
    %75 = tpu.matmul %73, %44, %cst_59 {dimension_numbers = #tpu.dot_dimension_numbers<[1], [0], [0], [1], [0, 0, 1, 1], [], []>} : vector<1x8xf32>, vector<8x128xf32>, vector<1x128xf32> -> vector<1x128xf32>
    %cst_60 = arith.constant 0.000000e+00 : f32
    %76 = vector.broadcast %cst_60 : f32 to vector<2x18x128xf32>
    %c0_61 = arith.constant 0 : index
    %c0_62 = arith.constant 0 : index
    %c0_63 = arith.constant 0 : index
    %77 = vector.load %arg11[%c0_61, %c0_62, %c0_63] : memref<2x18x128xf32, #tpu.memory_space<vmem>>, vector<2x18x128xf32>
    tpu.vector_store %arg11[%c0_61, %c0_62, %c0_63], %76 {strides = array<i32>} : memref<2x18x128xf32, #tpu.memory_space<vmem>>, vector<2x18x128xf32>,
    %78 = vector.broadcast %74 : vector<1x128xf32> to vector<16x128xf32>
    %79 = arith.mulf %20, %78 : vector<16x128xf32>
    %80 = vector.broadcast %75 : vector<1x128xf32> to vector<16x128xf32>
    %81 = arith.addf %79, %80 : vector<16x128xf32>
    %c0_64 = arith.constant 0 : index
    %c1_65 = arith.constant 1 : index
    %c0_66 = arith.constant 0 : index
    %82 = vector.load %arg11[%c0_64, %c1_65, %c0_66] : memref<2x18x128xf32, #tpu.memory_space<vmem>>, vector<1x16x128xf32>
    %83 = vector.shape_cast %82 : vector<1x16x128xf32> to vector<16x128xf32>
    %84 = vector.shape_cast %81 : vector<16x128xf32> to vector<1x16x128xf32>
    tpu.vector_store %arg11[%c0_64, %c1_65, %c0_66], %84 {strides = array<i32>} : memref<2x18x128xf32, #tpu.memory_space<vmem>>, vector<1x16x128xf32>,
    %85 = vector.broadcast %74 : vector<1x128xf32> to vector<16x128xf32>
    %86 = arith.mulf %41, %85 : vector<16x128xf32>
    %87 = vector.broadcast %75 : vector<1x128xf32> to vector<16x128xf32>
    %88 = arith.addf %86, %87 : vector<16x128xf32>
    %c1_67 = arith.constant 1 : index
    %c1_68 = arith.constant 1 : index
    %c0_69 = arith.constant 0 : index
    %89 = vector.load %arg11[%c1_67, %c1_68, %c0_69] : memref<2x18x128xf32, #tpu.memory_space<vmem>>, vector<1x16x128xf32>
    %90 = vector.shape_cast %89 : vector<1x16x128xf32> to vector<16x128xf32>
    %91 = vector.shape_cast %88 : vector<16x128xf32> to vector<1x16x128xf32>
    tpu.vector_store %arg11[%c1_67, %c1_68, %c0_69], %91 {strides = array<i32>} : memref<2x18x128xf32, #tpu.memory_space<vmem>>, vector<1x16x128xf32>,
    %cst_70 = arith.constant 0.000000e+00 : f32
    %92 = vector.broadcast %cst_70 : f32 to vector<16x128xf32>
    %c0_71 = arith.constant 0 : index
    %c0_72 = arith.constant 0 : index
    %c0_73 = arith.constant 0 : index
    %93 = vector.load %arg11[%c0_71, %c0_72, %c0_73] : memref<2x18x128xf32, #tpu.memory_space<vmem>>, vector<1x16x128xf32>
    %94 = vector.shape_cast %93 : vector<1x16x128xf32> to vector<16x128xf32>
    %c0_74 = arith.constant 0 : index
    %c0_75 = arith.constant 0 : index
    %c0_76 = arith.constant 0 : index
    %95 = vector.load %arg3[%c0_74, %c0_75, %c0_76] : memref<3x128x128xf32, #tpu.memory_space<vmem>>, vector<1x128x128xf32>
    %96 = vector.shape_cast %95 : vector<1x128x128xf32> to vector<128x128xf32>
    %cst_77 = arith.constant dense<0.000000e+00> : vector<16x128xf32>
    %97 = tpu.matmul %94, %96, %cst_77 {dimension_numbers = #tpu.dot_dimension_numbers<[1], [0], [0], [1], [0, 0, 1, 1], [], []>} : vector<16x128xf32>, vector<128x128xf32>, vector<16x128xf32> -> vector<16x128xf32>
    %98 = arith.addf %92, %97 : vector<16x128xf32>
    %c0_78 = arith.constant 0 : index
    %c1_79 = arith.constant 1 : index
    %c0_80 = arith.constant 0 : index
    %99 = vector.load %arg11[%c0_78, %c1_79, %c0_80] : memref<2x18x128xf32, #tpu.memory_space<vmem>>, vector<1x16x128xf32>
    %100 = vector.shape_cast %99 : vector<1x16x128xf32> to vector<16x128xf32>
    %c1_81 = arith.constant 1 : index
    %c0_82 = arith.constant 0 : index
    %c0_83 = arith.constant 0 : index
    %101 = vector.load %arg3[%c1_81, %c0_82, %c0_83] : memref<3x128x128xf32, #tpu.memory_space<vmem>>, vector<1x128x128xf32>
    %102 = vector.shape_cast %101 : vector<1x128x128xf32> to vector<128x128xf32>
    %cst_84 = arith.constant dense<0.000000e+00> : vector<16x128xf32>
    %103 = tpu.matmul %100, %102, %cst_84 {dimension_numbers = #tpu.dot_dimension_numbers<[1], [0], [0], [1], [0, 0, 1, 1], [], []>} : vector<16x128xf32>, vector<128x128xf32>, vector<16x128xf32> -> vector<16x128xf32>
    %104 = arith.addf %98, %103 : vector<16x128xf32>
    %c0_85 = arith.constant 0 : index
    %c2_86 = arith.constant 2 : index
    %c0_87 = arith.constant 0 : index
    %105 = vector.load %arg11[%c0_85, %c2_86, %c0_87] : memref<2x18x128xf32, #tpu.memory_space<vmem>>, vector<1x16x128xf32>
    %106 = vector.shape_cast %105 : vector<1x16x128xf32> to vector<16x128xf32>
    %c2_88 = arith.constant 2 : index
    %c0_89 = arith.constant 0 : index
    %c0_90 = arith.constant 0 : index
    %107 = vector.load %arg3[%c2_88, %c0_89, %c0_90] : memref<3x128x128xf32, #tpu.memory_space<vmem>>, vector<1x128x128xf32>
    %108 = vector.shape_cast %107 : vector<1x128x128xf32> to vector<128x128xf32>
    %cst_91 = arith.constant dense<0.000000e+00> : vector<16x128xf32>
    %109 = tpu.matmul %106, %108, %cst_91 {dimension_numbers = #tpu.dot_dimension_numbers<[1], [0], [0], [1], [0, 0, 1, 1], [], []>} : vector<16x128xf32>, vector<128x128xf32>, vector<16x128xf32> -> vector<16x128xf32>
    %110 = arith.addf %104, %109 : vector<16x128xf32>
    %cst_92 = arith.constant 0.000000e+00 : f32
    %111 = vector.broadcast %cst_92 : f32 to vector<16x128xf32>
    %112 = arith.maximumf %110, %111 : vector<16x128xf32>
    %cst_93 = arith.constant 0.000000e+00 : f32
    %113 = vector.broadcast %cst_93 : f32 to vector<16x128xf32>
    %c1_94 = arith.constant 1 : index
    %c0_95 = arith.constant 0 : index
    %c0_96 = arith.constant 0 : index
    %114 = vector.load %arg11[%c1_94, %c0_95, %c0_96] : memref<2x18x128xf32, #tpu.memory_space<vmem>>, vector<1x16x128xf32>
    %115 = vector.shape_cast %114 : vector<1x16x128xf32> to vector<16x128xf32>
    %c0_97 = arith.constant 0 : index
    %c0_98 = arith.constant 0 : index
    %c0_99 = arith.constant 0 : index
    %116 = vector.load %arg3[%c0_97, %c0_98, %c0_99] : memref<3x128x128xf32, #tpu.memory_space<vmem>>, vector<1x128x128xf32>
    %117 = vector.shape_cast %116 : vector<1x128x128xf32> to vector<128x128xf32>
    %cst_100 = arith.constant dense<0.000000e+00> : vector<16x128xf32>
    %118 = tpu.matmul %115, %117, %cst_100 {dimension_numbers = #tpu.dot_dimension_numbers<[1], [0], [0], [1], [0, 0, 1, 1], [], []>} : vector<16x128xf32>, vector<128x128xf32>, vector<16x128xf32> -> vector<16x128xf32>
    %119 = arith.addf %113, %118 : vector<16x128xf32>
    %c1_101 = arith.constant 1 : index
    %c1_102 = arith.constant 1 : index
    %c0_103 = arith.constant 0 : index
    %120 = vector.load %arg11[%c1_101, %c1_102, %c0_103] : memref<2x18x128xf32, #tpu.memory_space<vmem>>, vector<1x16x128xf32>
    %121 = vector.shape_cast %120 : vector<1x16x128xf32> to vector<16x128xf32>
    %c1_104 = arith.constant 1 : index
    %c0_105 = arith.constant 0 : index
    %c0_106 = arith.constant 0 : index
    %122 = vector.load %arg3[%c1_104, %c0_105, %c0_106] : memref<3x128x128xf32, #tpu.memory_space<vmem>>, vector<1x128x128xf32>
    %123 = vector.shape_cast %122 : vector<1x128x128xf32> to vector<128x128xf32>
    %cst_107 = arith.constant dense<0.000000e+00> : vector<16x128xf32>
    %124 = tpu.matmul %121, %123, %cst_107 {dimension_numbers = #tpu.dot_dimension_numbers<[1], [0], [0], [1], [0, 0, 1, 1], [], []>} : vector<16x128xf32>, vector<128x128xf32>, vector<16x128xf32> -> vector<16x128xf32>
    %125 = arith.addf %119, %124 : vector<16x128xf32>
    %c1_108 = arith.constant 1 : index
    %c2_109 = arith.constant 2 : index
    %c0_110 = arith.constant 0 : index
    %126 = vector.load %arg11[%c1_108, %c2_109, %c0_110] : memref<2x18x128xf32, #tpu.memory_space<vmem>>, vector<1x16x128xf32>
    %127 = vector.shape_cast %126 : vector<1x16x128xf32> to vector<16x128xf32>
    %c2_111 = arith.constant 2 : index
    %c0_112 = arith.constant 0 : index
    %c0_113 = arith.constant 0 : index
    %128 = vector.load %arg3[%c2_111, %c0_112, %c0_113] : memref<3x128x128xf32, #tpu.memory_space<vmem>>, vector<1x128x128xf32>
    %129 = vector.shape_cast %128 : vector<1x128x128xf32> to vector<128x128xf32>
    %cst_114 = arith.constant dense<0.000000e+00> : vector<16x128xf32>
    %130 = tpu.matmul %127, %129, %cst_114 {dimension_numbers = #tpu.dot_dimension_numbers<[1], [0], [0], [1], [0, 0, 1, 1], [], []>} : vector<16x128xf32>, vector<128x128xf32>, vector<16x128xf32> -> vector<16x128xf32>
    %131 = arith.addf %125, %130 : vector<16x128xf32>
    %cst_115 = arith.constant 0.000000e+00 : f32
    %132 = vector.broadcast %cst_115 : f32 to vector<16x128xf32>
    %133 = arith.maximumf %131, %132 : vector<16x128xf32>
    %c0_116 = arith.constant 0 : index
    %c0_117 = arith.constant 0 : index
    %134 = vector.load %arg6[%c0_116, %c0_117] : memref<1x8xf32, #tpu.memory_space<vmem>>, vector<1x8xf32>
    %c0_118 = arith.constant 0 : index
    %c0_119 = arith.constant 0 : index
    %135 = vector.load %arg7[%c0_118, %c0_119] : memref<1x8xf32, #tpu.memory_space<vmem>>, vector<1x8xf32>
    %c0_120 = arith.constant 0 : index
    %c0_121 = arith.constant 0 : index
    %136 = vector.load %arg9[%c0_120, %c0_121] : memref<8x128xf32, #tpu.memory_space<vmem>>, vector<8x128xf32>
    %cst_122 = arith.constant dense<0.000000e+00> : vector<128xf32>
    %137 = vector.multi_reduction <add>, %112, %cst_122 [0] : vector<16x128xf32> to vector<128xf32>
    %138 = vector.shape_cast %137 : vector<128xf32> to vector<1x128xf32>
    %cst_123 = arith.constant dense<0.000000e+00> : vector<128xf32>
    %139 = vector.multi_reduction <add>, %133, %cst_123 [0] : vector<16x128xf32> to vector<128xf32>
    %140 = vector.shape_cast %139 : vector<128xf32> to vector<1x128xf32>
    %141 = arith.addf %138, %140 : vector<1x128xf32>
    %cst_124 = arith.constant dense<0.000000e+00> : vector<1x8xf32>
    %142 = tpu.matmul %141, %136, %cst_124 {dimension_numbers = #tpu.dot_dimension_numbers<[1], [1], [0], [0], [0, 0, 1, 0], [], []>} : vector<1x128xf32>, vector<8x128xf32>, vector<1x8xf32> -> vector<1x8xf32>
    %cst_125 = arith.constant 0.001953125 : f32
    %143 = vector.broadcast %cst_125 : f32 to vector<1x8xf32>
    %144 = arith.mulf %142, %143 : vector<1x8xf32>
    %cst_126 = arith.constant dense<0.000000e+00> : vector<1x128xf32>
    %145 = tpu.matmul %144, %136, %cst_126 {dimension_numbers = #tpu.dot_dimension_numbers<[1], [0], [0], [1], [0, 0, 1, 1], [], []>} : vector<1x8xf32>, vector<8x128xf32>, vector<1x128xf32> -> vector<1x128xf32>
    %146 = vector.broadcast %145 : vector<1x128xf32> to vector<16x128xf32>
    %147 = arith.subf %112, %146 : vector<16x128xf32>
    %148 = arith.mulf %147, %147 : vector<16x128xf32>
    %cst_127 = arith.constant dense<0.000000e+00> : vector<128xf32>
    %149 = vector.multi_reduction <add>, %148, %cst_127 [0] : vector<16x128xf32> to vector<128xf32>
    %150 = vector.shape_cast %149 : vector<128xf32> to vector<1x128xf32>
    %151 = vector.broadcast %145 : vector<1x128xf32> to vector<16x128xf32>
    %152 = arith.subf %133, %151 : vector<16x128xf32>
    %153 = arith.mulf %152, %152 : vector<16x128xf32>
    %cst_128 = arith.constant dense<0.000000e+00> : vector<128xf32>
    %154 = vector.multi_reduction <add>, %153, %cst_128 [0] : vector<16x128xf32> to vector<128xf32>
    %155 = vector.shape_cast %154 : vector<128xf32> to vector<1x128xf32>
    %156 = arith.addf %150, %155 : vector<1x128xf32>
    %cst_129 = arith.constant dense<0.000000e+00> : vector<1x8xf32>
    %157 = tpu.matmul %156, %136, %cst_129 {dimension_numbers = #tpu.dot_dimension_numbers<[1], [1], [0], [0], [0, 0, 1, 0], [], []>} : vector<1x128xf32>, vector<8x128xf32>, vector<1x8xf32> -> vector<1x8xf32>
    %cst_130 = arith.constant 0.001953125 : f32
    %158 = vector.broadcast %cst_130 : f32 to vector<1x8xf32>
    %159 = arith.mulf %157, %158 : vector<1x8xf32>
    %cst_131 = arith.constant 9.99999974E-6 : f32
    %160 = vector.broadcast %cst_131 : f32 to vector<1x8xf32>
    %161 = arith.addf %159, %160 : vector<1x8xf32>
    %162 = math.rsqrt %161 : vector<1x8xf32>
    %163 = arith.mulf %134, %162 : vector<1x8xf32>
    %164 = arith.mulf %144, %163 : vector<1x8xf32>
    %165 = arith.subf %135, %164 : vector<1x8xf32>
    %cst_132 = arith.constant dense<0.000000e+00> : vector<1x128xf32>
    %166 = tpu.matmul %163, %136, %cst_132 {dimension_numbers = #tpu.dot_dimension_numbers<[1], [0], [0], [1], [0, 0, 1, 1], [], []>} : vector<1x8xf32>, vector<8x128xf32>, vector<1x128xf32> -> vector<1x128xf32>
    %cst_133 = arith.constant dense<0.000000e+00> : vector<1x128xf32>
    %167 = tpu.matmul %165, %136, %cst_133 {dimension_numbers = #tpu.dot_dimension_numbers<[1], [0], [0], [1], [0, 0, 1, 1], [], []>} : vector<1x8xf32>, vector<8x128xf32>, vector<1x128xf32> -> vector<1x128xf32>
    %168 = vector.broadcast %166 : vector<1x128xf32> to vector<16x128xf32>
    %169 = arith.mulf %112, %168 : vector<16x128xf32>
    %170 = vector.broadcast %167 : vector<1x128xf32> to vector<16x128xf32>
    %171 = arith.addf %169, %170 : vector<16x128xf32>
    %c0_134 = arith.constant 0 : index
    %c0_135 = arith.constant 0 : index
    %172 = vector.load %arg10[%c0_134, %c0_135] : memref<32x128xf32, #tpu.memory_space<vmem>>, vector<16x128xf32>
    tpu.vector_store %arg10[%c0_134, %c0_135], %171 {strides = array<i32>} : memref<32x128xf32, #tpu.memory_space<vmem>>, vector<16x128xf32>,
    %173 = vector.broadcast %166 : vector<1x128xf32> to vector<16x128xf32>
    %174 = arith.mulf %133, %173 : vector<16x128xf32>
    %175 = vector.broadcast %167 : vector<1x128xf32> to vector<16x128xf32>
    %176 = arith.addf %174, %175 : vector<16x128xf32>
    %c16 = arith.constant 16 : index
    %c0_136 = arith.constant 0 : index
    %177 = vector.load %arg10[%c16, %c0_136] : memref<32x128xf32, #tpu.memory_space<vmem>>, vector<16x128xf32>
    tpu.vector_store %arg10[%c16, %c0_136], %176 {strides = array<i32>} : memref<32x128xf32, #tpu.memory_space<vmem>>, vector<16x128xf32>,
    return
  }
  func.func @transform_0(%arg0: i32) -> (i32, i32, i32) {
    %c0_i32 = arith.constant 0 : i32
    %c0_i32_0 = arith.constant 0 : i32
    %c0_i32_1 = arith.constant 0 : i32
    %c0_i32_2 = arith.constant 0 : i32
    return %c0_i32, %c0_i32_0, %c0_i32_1 : i32, i32, i32
  }
  func.func @transform_1(%arg0: i32) -> (i32, i32, i32) {
    %c0_i32 = arith.constant 0 : i32
    %c0_i32_0 = arith.constant 0 : i32
    %c0_i32_1 = arith.constant 0 : i32
    %c0_i32_2 = arith.constant 0 : i32
    return %c0_i32, %c0_i32_0, %c0_i32_1 : i32, i32, i32
  }
  func.func @transform_2(%arg0: i32) -> (i32, i32, i32) {
    %c0_i32 = arith.constant 0 : i32
    %c0_i32_0 = arith.constant 0 : i32
    %c0_i32_1 = arith.constant 0 : i32
    %c0_i32_2 = arith.constant 0 : i32
    return %c0_i32, %c0_i32_0, %c0_i32_1 : i32, i32, i32
  }
  func.func @transform_3(%arg0: i32) -> (i32, i32) {
    %c0_i32 = arith.constant 0 : i32
    %c0_i32_0 = arith.constant 0 : i32
    %c0_i32_1 = arith.constant 0 : i32
    return %c0_i32, %c0_i32_0 : i32, i32
  }
  func.func @transform_4(%arg0: i32) -> (i32, i32) {
    %c0_i32 = arith.constant 0 : i32
    %c0_i32_0 = arith.constant 0 : i32
    %c0_i32_1 = arith.constant 0 : i32
    return %c0_i32, %c0_i32_0 : i32, i32
  }
  func.func @transform_5(%arg0: i32) -> (i32, i32) {
    %c0_i32 = arith.constant 0 : i32
    %c0_i32_0 = arith.constant 0 : i32
    %c0_i32_1 = arith.constant 0 : i32
    return %c0_i32, %c0_i32_0 : i32, i32
  }
  func.func @transform_6(%arg0: i32) -> (i32, i32) {
    %c0_i32 = arith.constant 0 : i32
    %c0_i32_0 = arith.constant 0 : i32
    %c0_i32_1 = arith.constant 0 : i32
    return %c0_i32, %c0_i32_0 : i32, i32
  }
  func.func @transform_7(%arg0: i32) -> (i32, i32) {
    %c0_i32 = arith.constant 0 : i32
    %c0_i32_0 = arith.constant 0 : i32
    %c0_i32_1 = arith.constant 0 : i32
    return %c0_i32, %c0_i32_0 : i32, i32
  }
  func.func @transform_8(%arg0: i32) -> (i32, i32) {
    %c0_i32 = arith.constant 0 : i32
    %c0_i32_0 = arith.constant 0 : i32
    %c0_i32_1 = arith.constant 0 : i32
    return %c0_i32, %c0_i32_0 : i32, i32
  }
  func.func @transform_9(%arg0: i32) -> (i32, i32) {
    %c0_i32 = arith.constant 0 : i32
    %c0_i32_0 = arith.constant 0 : i32
    %c0_i32_1 = arith.constant 0 : i32
    return %c0_i32, %c0_i32_0 : i32, i32
  }
}

</mosaic_0001>

<bundles_post_ra>
// kernel: tile.14
= control target key start
LH: loop header
LB: loop body
LE: loop exit
PB: predicated region body
PF: predicated region fallthrough
CT: control target
= control target key end

     0   :  { %vm6_vm0 = vcmask 1043458   ;;  %vm10_vm1 = vcmask 1045508   ;;  %vm14_vm2 = vcmask 1047558   ;;  %s19_s6 = smov 3  ;;  %s22_s7 = smov 12  ;;  %vm16_vm3 = vcmask 64512   ;;  %s736_s0 = inlined_call_operand.vmem [shape: f32[8,16,8], index: 0, kind: input, shape index: {}]   ;;  %s737_s1 = inlined_call_operand.vmem [shape: f32[8,128], index: 1, kind: output, shape index: {}]  }
   0x1   :  { %v348_v0 = vld [vmem:[%s736_s0 + $0xf] ss:$16 sm:%s19_s6]   ;;  %s27_s12 = smov 48  ;;  %s32_s13 = smov 192  ;;  %vm38_vm4 = vcmask 1048512   ;;  %vm60_vm5 = vcmask 982912  }
   0x2   :  { %v349_v1 = vld [vmem:[%s736_s0 + $0xf] ss:$16 sm:%s22_s7]   ;;  %s63_s18 = smov 3  ;;  %s66_s21 = smov 12  ;;  %vm82_vm6 = vcmask 917312   ;;  %vm104_vm7 = vcmask 851712  }
   0x3   :  { %v25_v2 = vsel %vm6_vm0, %v349_v1, %v348_v0  ;;  %v350_v3 = vld [vmem:[%s736_s0 + $0xf] ss:$16 sm:%s27_s12]   ;;  %v356_v6 = vld [vmem:[%s736_s0 + $0xd] ss:$16 sm:%s63_s18]   ;;  %s71_s22 = smov 48  ;;  %s76_s27 = smov 192 }
   0x4   :  { %v351_v4 = vld [vmem:[%s736_s0 + $0xf] ss:$16 sm:%s32_s13]   ;;  %v30_v5 = vsel %vm10_vm1, %v350_v3, %v25_v2  ;;  %v357_v8 = vld [vmem:[%s736_s0 + $0xd] ss:$16 sm:%s66_s21]   ;;  %s423_s28 = smov 120   ;;  %s41_s2 = smov 3 }
   0x5   :  { %v35_v7 = vsel %vm14_vm2, %v351_v4, %v30_v5  ;;  %v358_v9 = vld [vmem:[%s736_s0 + $0xd] ss:$16 sm:%s71_s22]   ;;  %v69_v10 = vsel %vm6_vm0, %v357_v8, %v356_v6  ;;  %s44_s3 = smov 12  ;;  %v352_v13 = vld [vmem:[%s736_s0 + $0xe] ss:$16 sm:%s41_s2]   ;;  %s49_s8 = smov 48 }
   0x6   :  { %36 = vrot.lane.b32.xlu0 %v35_v7, %s423_s28  ;;  %v359_v11 = vld [vmem:[%s736_s0 + $0xd] ss:$16 sm:%s76_s27]   ;;  %v74_v12 = vsel %vm10_vm1, %v358_v9, %v69_v10  ;;  %s54_s9 = smov 192  ;;  %s85_s14 = smov 3  ;;  %vm126_vm8 = vcmask 786112   ;;  %vm148_vm9 = vcmask 720512  }
   0x7   :  { %v353_v14 = vld [vmem:[%s736_s0 + $0xe] ss:$16 sm:%s44_s3]   ;;  %v79_v15 = vsel %vm14_vm2, %v359_v11, %v74_v12  ;;  %s424_s15 = smov 104   ;;  %v360_v20 = vld [vmem:[%s736_s0 + $0xc] ss:$16 sm:%s85_s14]   ;;  %s88_s18 = smov 12 }
   0x8   :  { %v47_v16 = vsel %vm6_vm0, %v353_v14, %v352_v13  ;;  %v354_v17 = vld [vmem:[%s736_s0 + $0xe] ss:$16 sm:%s49_s8]   ;;  %80 = vrot.lane.b32.xlu1 %v79_v15, %s424_s15  ;;  %s93_s19 = smov 48  ;;  %s98_s24 = smov 192  ;;  %vm170_vm10 = vcmask 654912   ;;  %vm192_vm11 = vcmask 589312  }
   0x9   :  { %v355_v18 = vld [vmem:[%s736_s0 + $0xe] ss:$16 sm:%s54_s9]   ;;  %v52_v19 = vsel %vm10_vm1, %v354_v17, %v47_v16  ;;  %v361_v21 = vld [vmem:[%s736_s0 + $0xc] ss:$16 sm:%s88_s18]   ;;  %s151_s27 = smov 3  ;;  %s154_s28 = smov 12 }
   0xa   :  { %v362_v22 = vld [vmem:[%s736_s0 + $0xc] ss:$16 sm:%s93_s19]   ;;  %v57_v23 = vsel %vm14_vm2, %v355_v18, %v52_v19  ;;  %v91_v24 = vsel %vm6_vm0, %v361_v21, %v360_v20  ;;  %v372_v27 = vld [vmem:[%s736_s0 + $0x9] ss:$16 sm:%s151_s27]   ;;  %s159_s4 = smov 48  ;;  %s164_s7 = smov 192 }
   0xb   :  { %v363_v25 = vld [vmem:[%s736_s0 + $0xc] ss:$16 sm:%s98_s24]   ;;  %v96_v26 = vsel %vm10_vm1, %v362_v22, %v91_v24  ;;  %v373_v28 = vld [vmem:[%s736_s0 + $0x9] ss:$16 sm:%s154_s28]   ;;  %s173_s8 = smov 3  ;;  %s425_s9 = smov 112  }
   0xc   :  { %v157_v29 = vsel %vm6_vm0, %v373_v28, %v372_v27  ;;  %v374_v30 = vld [vmem:[%s736_s0 + $0x9] ss:$16 sm:%s159_s4]   ;;  %v101_v31 = vsel %vm14_vm2, %v363_v25, %v96_v26  ;;  %v376_v32 = vld [vmem:[%s736_s0 + $0x8] ss:$16 sm:%s173_s8]   ;;  %s176_s12 = smov 12  ;;  %s181_s13 = smov 48 }
   0xd   :  { %v377_v33 = vld [vmem:[%s736_s0 + $0x8] ss:$16 sm:%s176_s12]   ;;  %s186_s16 = smov 192  ;;  %v162_v34 = vsel %vm10_vm1, %v374_v30, %v157_v29  ;;  %v375_v35 = vld [vmem:[%s736_s0 + $0x9] ss:$16 sm:%s164_s7]   ;;  %s217_s21 = smov 3 }
   0xe   :  { %58 = vrot.lane.b32.xlu0 %v57_v23, %s425_s9  ;;  %v179_v36 = vsel %vm6_vm0, %v377_v33, %v376_v32  ;;  %v378_v37 = vld [vmem:[%s736_s0 + $0x8] ss:$16 sm:%s181_s13]   ;;  %s220_s22 = smov 12  ;;  %s426_s23 = smov 96   ;;  %v167_v40 = vsel %vm14_vm2, %v375_v35, %v162_v34  ;;  %vm214_vm12 = vcmask 523712   ;;  %vm236_vm13 = vcmask 458112  }
   0xf   :  { %s225_s24 = smov 48  ;;  %v384_v38 = vld [vmem:[%s736_s0 + $0x6] ss:$16 sm:%s217_s21]   ;;  %s239_s29 = smov 3  ;;  %v184_v41 = vsel %vm10_vm1, %v378_v37, %v179_v36  ;;  %v379_v42 = vld [vmem:[%s736_s0 + $0x8] ss:$16 sm:%s186_s16]  }
  0x10   :  { %102 = vrot.lane.b32.xlu1 %v101_v31, %s426_s23  ;;  %v385_v39 = vld [vmem:[%s736_s0 + $0x6] ss:$16 sm:%s220_s22]   ;;  %s230_s3 = smov 192  ;;  %s242_s4 = smov 12  ;;  %v189_v47 = vsel %vm14_vm2, %v379_v42, %v184_v41  ;;  %vm258_vm14 = vcmask 392512   ;;  %vm280_vm15 = vcmask 326912  }
  0x11   :  { %v386_v43 = vld [vmem:[%s736_s0 + $0x6] ss:$16 sm:%s225_s24]   ;;  %s247_s7 = smov 48  ;;  %v223_v44 = vsel %vm6_vm0, %v385_v39, %v384_v38  ;;  %v388_v45 = vld [vmem:[%s736_s0 + $0x5] ss:$16 sm:%s239_s29]   ;;  %s107_s12 = smov 3 }
  0x12   :  { %v389_v46 = vld [vmem:[%s736_s0 + $0x5] ss:$16 sm:%s242_s4]   ;;  %s110_s13 = smov 12  ;;  %s427_s14 = smov 72   ;;  %v387_v48 = vld [vmem:[%s736_s0 + $0x6] ss:$16 sm:%s230_s3]   ;;  %v228_v52 = vsel %vm10_vm1, %v386_v43, %v223_v44 }
  0x13   :  { %v364_v49 = vld [vmem:[%s736_s0 + $0xb] ss:$16 sm:%s107_s12]   ;;  %s115_s19 = smov 48  ;;  %s120_s20 = smov 192  ;;  %v245_v53 = vsel %vm6_vm0, %v389_v46, %v388_v45  ;;  %v390_v54 = vld [vmem:[%s736_s0 + $0x5] ss:$16 sm:%s247_s7]   ;;  %v233_v61 = vsel %vm14_vm2, %v387_v48, %v228_v52 }
  0x14   :  { %s252_s21 = smov 192  ;;  %v365_v50 = vld [vmem:[%s736_s0 + $0xb] ss:$16 sm:%s110_s13]   ;;  %s283_s26 = smov 3  ;;  %v250_v62 = vsel %vm10_vm1, %v390_v54, %v245_v53 }
  0x15   :  { %v366_v51 = vld [vmem:[%s736_s0 + $0xb] ss:$16 sm:%s115_s19]   ;;  %v113_v55 = vsel %vm6_vm0, %v365_v50, %v364_v49  ;;  %s286_s2 = smov 12  ;;  %s428_s3 = smov 64   ;;  %v396_v59 = vld [vmem:[%s736_s0 + $0x3] ss:$16 sm:%s283_s26]  }
  0x16   :  { %168 = vrot.lane.b32.xlu0 %v167_v40, %s427_s14  ;;  %v367_v56 = vld [vmem:[%s736_s0 + $0xb] ss:$16 sm:%s120_s20]   ;;  %v118_v57 = vsel %vm10_vm1, %v366_v51, %v113_v55  ;;  %s291_s4 = smov 48  ;;  %s305_s9 = smov 3 }
  0x17   :  { %v123_v58 = vsel %vm14_vm2, %v367_v56, %v118_v57  ;;  %v397_v60 = vld [vmem:[%s736_s0 + $0x3] ss:$16 sm:%s286_s2]   ;;  %s308_s10 = smov 12  ;;  %v391_v63 = vld [vmem:[%s736_s0 + $0x5] ss:$16 sm:%s252_s21]   ;;  %s429_s13 = smov 88  }
  0x18   :  { %190 = vrot.lane.b32.xlu1 %v189_v47, %s428_s3  ;;  %124 = vrot.lane.b32.xlu2 %v123_v58, %s429_s13  ;;  %s296_s14 = smov 192  ;;  %s313_s15 = smov 48  ;;  %v398_v0 = vld [vmem:[%s736_s0 + $0x3] ss:$16 sm:%s291_s4]   ;;  %v289_v2 = vsel %vm6_vm0, %v397_v60, %v396_v59  ;;  %v255_v5 = vsel %vm14_vm2, %v391_v63, %v250_v62 }
  0x19   :  { %v400_v1 = vld [vmem:[%s736_s0 + $0x2] ss:$16 sm:%s305_s9]   ;;  %s129_s20 = smov 3  ;;  %s132_s25 = smov 12  ;;  %v399_v6 = vld [vmem:[%s736_s0 + $0x3] ss:$16 sm:%s296_s14]   ;;  %v294_v12 = vsel %vm10_vm1, %v398_v0, %v289_v2 }
  0x1a   :  { %v401_v3 = vld [vmem:[%s736_s0 + $0x2] ss:$16 sm:%s308_s10]   ;;  %v368_v4 = vld [vmem:[%s736_s0 + $0xa] ss:$16 sm:%s129_s20]   ;;  %s137_s26 = smov 48  ;;  %s430_s27 = smov 48   ;;  %v299_v20 = vsel %vm14_vm2, %v399_v6, %v294_v12 }
  0x1b   :  { %v402_v7 = vld [vmem:[%s736_s0 + $0x2] ss:$16 sm:%s313_s15]   ;;  %s318_s3 = smov 192  ;;  %v369_v8 = vld [vmem:[%s736_s0 + $0xa] ss:$16 sm:%s132_s25]   ;;  %s142_s6 = smov 192  ;;  %v311_v13 = vsel %vm6_vm0, %v401_v3, %v400_v1 }
  0x1c   :  { %v135_v9 = vsel %vm6_vm0, %v369_v8, %v368_v4  ;;  %v370_v10 = vld [vmem:[%s736_s0 + $0xa] ss:$16 sm:%s137_s26]   ;;  %s195_s11 = smov 3  ;;  %s198_s12 = smov 12  ;;  %v316_v21 = vsel %vm10_vm1, %v402_v7, %v311_v13  ;;  %v403_v22 = vld [vmem:[%s736_s0 + $0x2] ss:$16 sm:%s318_s3]  }
  0x1d   :  { %v371_v11 = vld [vmem:[%s736_s0 + $0xa] ss:$16 sm:%s142_s6]   ;;  %v140_v14 = vsel %vm10_vm1, %v370_v10, %v135_v9  ;;  %v380_v15 = vld [vmem:[%s736_s0 + $0x7] ss:$16 sm:%s195_s11]   ;;  %s203_s17 = smov 48  ;;  %s431_s18 = smov 40   ;;  %v321_v25 = vsel %vm14_vm2, %v403_v22, %v316_v21 }
  0x1e   :  { %234 = vrot.lane.b32.xlu0 %v233_v61, %s430_s27  ;;  %v381_v16 = vld [vmem:[%s736_s0 + $0x7] ss:$16 sm:%s198_s12]   ;;  %v145_v17 = vsel %vm14_vm2, %v371_v11, %v140_v14  ;;  %s208_s21 = smov 192  ;;  %s432_s24 = smov 80  }
  0x1f   :  { %v201_v18 = vsel %vm6_vm0, %v381_v16, %v380_v15  ;;  %v382_v19 = vld [vmem:[%s736_s0 + $0x7] ss:$16 sm:%s203_s17]   ;;  %s261_s25 = smov 3  ;;  %s264_s26 = smov 12 }
  0x20   :  { %256 = vrot.lane.b32.xlu1 %v255_v5, %s431_s18  ;;  %146 = vrot.lane.b32.xlu2 %v145_v17, %s432_s24  ;;  %v206_v23 = vsel %vm10_vm1, %v382_v19, %v201_v18  ;;  %v383_v24 = vld [vmem:[%s736_s0 + $0x7] ss:$16 sm:%s208_s21]   ;;  %s433_s29 = smov 24   ;;  %s269_s5 = smov 48 }
  0x21   :  { %v392_v26 = vld [vmem:[%s736_s0 + $0x4] ss:$16 sm:%s261_s25]   ;;  %v211_v28 = vsel %vm14_vm2, %v383_v24, %v206_v23  ;;  %s434_s6 = smov 16   ;;  %s274_s9 = smov 192 }
  0x22   :  { %v393_v27 = vld [vmem:[%s736_s0 + $0x4] ss:$16 sm:%s264_s26]   ;;  %s435_s10 = smov 56   ;;  %s327_s11 = smov 3 }
  0x23   :  { %v267_v29 = vsel %vm6_vm0, %v393_v27, %v392_v26  ;;  %v394_v30 = vld [vmem:[%s736_s0 + $0x4] ss:$16 sm:%s269_s5]   ;;  %s330_s12 = smov 12  ;;  %v404_v33 = vld [vmem:[%s736_s0 + $0x1] ss:$16 sm:%s327_s11]   ;;  %s335_s19 = smov 48 }
  0x24   :  { %v272_v31 = vsel %vm10_vm1, %v394_v30, %v267_v29  ;;  %v395_v32 = vld [vmem:[%s736_s0 + $0x4] ss:$16 sm:%s274_s9]   ;;  %v405_v34 = vld [vmem:[%s736_s0 + $0x1] ss:$16 sm:%s330_s12]   ;;  %s340_s22 = smov 192  ;;  %s436_s23 = smov 32  }
  0x25   :  { %v277_v35 = vsel %vm14_vm2, %v395_v32, %v272_v31  ;;  %v333_v36 = vsel %vm6_vm0, %v405_v34, %v404_v33  ;;  %v406_v37 = vld [vmem:[%s736_s0 + $0x1] ss:$16 sm:%s335_s19]   ;;  %s437_s26 = smov 8   ;;  %s2_s27 = smov 3 }
  0x26   :  { %300 = vrot.lane.b32.xlu0 %v299_v20, %s433_s29  ;;  %v338_v38 = vsel %vm10_vm1, %v406_v37, %v333_v36  ;;  %v407_v39 = vld [vmem:[%s736_s0 + $0x1] ss:$16 sm:%s340_s22]   ;;  %s4_s28 = smov 12  ;;  %s8_s29 = smov 48 }
  0x27   :  { %v343_v40 = vsel %vm14_vm2, %v407_v39, %v338_v38  ;;  %s12_s30 = smov 192  ;;  %v3_v41 = vld [vmem:[%s736_s0] ss:$16 sm:%s2_s27]  }
  0x28   :  { %322 = vrot.lane.b32.xlu1 %v321_v25, %s434_s6  ;;  %212 = vrot.lane.b32.xlu2 %v211_v28, %s435_s10  ;;  %v5_v42 = vld [vmem:[%s736_s0] ss:$16 sm:%s4_s28]  }
  0x29   :  { %v7_v43 = vsel %vm6_vm0, %v5_v42, %v3_v41  ;;  %v9_v44 = vld [vmem:[%s736_s0] ss:$16 sm:%s8_s29]   ;;  %vm302_vm0 = vcmask 261312  }
  0x2a   :  { %v11_v45 = vsel %vm10_vm1, %v9_v44, %v7_v43  ;;  %v13_v46 = vld [vmem:[%s736_s0] ss:$16 sm:%s12_s30]   ;;  %vm324_vm1 = vcmask 195712  }
  0x2b   :  { %v15_v47 = vsel %vm14_vm2, %v13_v46, %v11_v45  ;;  %vm346_vm2 = vcmask 130112  }
  0x2c   :  { %17 = vst.msk [vmem:[%s737_s1] sm:$0xff] %vm16_vm3, %v15_v47  }
  0x30   :  { %278 = vrot.lane.b32.xlu2 %v277_v35, %s436_s23 }
  0x38   :  { %344 = vrot.lane.b32.xlu2 %v343_v40, %s437_s26 }
  0x72   :  { %v125_v48 = vpop.permute.xlu2 %124  }
  0x78   :  { %v37_v49 = vpop.permute.xlu0 %36  }
  0x79   :  { %39 = vst.msk [vmem:[%s737_s1] sm:$0xff] %vm38_vm4, %v37_v49  }
  0x7a   :  { %v81_v50 = vpop.permute.xlu1 %80   ;;  %v147_v51 = vpop.permute.xlu2 %146  }
  0x80   :  { %v59_v52 = vpop.permute.xlu0 %58  }
  0x81   :  { %61 = vst.msk [vmem:[%s737_s1] sm:$0xff] %vm60_vm5, %v59_v52  }
  0x82   :  { %83 = vst.msk [vmem:[%s737_s1] sm:$0xff] %vm82_vm6, %v81_v50   ;;  %v103_v53 = vpop.permute.xlu1 %102   ;;  %v213_v54 = vpop.permute.xlu2 %212  }
  0x83   :  { %105 = vst.msk [vmem:[%s737_s1] sm:$0xff] %vm104_vm7, %v103_v53  }
  0x84   :  { %127 = vst.msk [vmem:[%s737_s1] sm:$0xff] %vm126_vm8, %v125_v48  }
  0x85   :  { %149 = vst.msk [vmem:[%s737_s1] sm:$0xff] %vm148_vm9, %v147_v51  }
  0x88   :  { %v169_v55 = vpop.permute.xlu0 %168  }
  0x89   :  { %171 = vst.msk [vmem:[%s737_s1] sm:$0xff] %vm170_vm10, %v169_v55  }
  0x8a   :  { %v191_v56 = vpop.permute.xlu1 %190   ;;  %v279_v57 = vpop.permute.xlu2 %278  }
  0x8b   :  { %193 = vst.msk [vmem:[%s737_s1] sm:$0xff] %vm192_vm11, %v191_v56  }
  0x8c   :  { %215 = vst.msk [vmem:[%s737_s1] sm:$0xff] %vm214_vm12, %v213_v54  }
  0x90   :  { %v235_v58 = vpop.permute.xlu0 %234  }
  0x91   :  { %237 = vst.msk [vmem:[%s737_s1] sm:$0xff] %vm236_vm13, %v235_v58  }
  0x92   :  { %v257_v59 = vpop.permute.xlu1 %256   ;;  %v345_v60 = vpop.permute.xlu2 %344  }
  0x93   :  { %259 = vst.msk [vmem:[%s737_s1] sm:$0xff] %vm258_vm14, %v257_v59  }
  0x94   :  { %281 = vst.msk [vmem:[%s737_s1] sm:$0xff] %vm280_vm15, %v279_v57  }
  0x98   :  { %v301_v61 = vpop.permute.xlu0 %300  }
  0x99   :  { %303 = vst.msk [vmem:[%s737_s1] sm:$0xff] %vm302_vm0, %v301_v61  }
  0x9a   :  { %v323_v62 = vpop.permute.xlu1 %322  }
  0x9b   :  { %325 = vst.msk [vmem:[%s737_s1] sm:$0xff] %vm324_vm1, %v323_v62  }
  0x9c   :  { %347 = vst.msk [vmem:[%s737_s1] sm:$0xff] %vm346_vm2, %v345_v60  }

// kernel: double_conv3_forward.1
= control target key start
LH: loop header
LB: loop body
LE: loop exit
PB: predicated region body
PF: predicated region fallthrough
CT: control target
= control target key end

     0   :  { %vm53_vm0 = vcmask 523264   ;;  %vm293_vm1 = vcmask 64512   ;;  %s1401_s1 = inlined_call_operand.vmem [shape: f32[3,64,128], index: 1, kind: input, shape index: {}]   ;;  %s1402_s0 = inlined_call_operand.vmem [shape: f32[2,18,64], index: 0, kind: input, shape index: {}]   ;;  %s1403_s7 = inlined_call_operand.vmem [shape: f32[8,128], index: 7, kind: input, shape index: {}, may-alias: {7,8}]   ;;  %s1404_s2 = inlined_call_operand.vmem [shape: f32[3,128,128], index: 2, kind: input, shape index: {}]   ;;  %s1405_s3 = inlined_call_operand.vmem [shape: f32[1,8], index: 3, kind: input, shape index: {}]   ;;  %s1406_s4 = inlined_call_operand.vmem [shape: f32[1,8], index: 4, kind: input, shape index: {}]   ;;  %s1407_s8 = inlined_call_operand.vmem [shape: f32[8,128], index: 8, kind: input, shape index: {}, may-alias: {7,8}]   ;;  %s1408_s5 = inlined_call_operand.vmem [shape: f32[1,8], index: 5, kind: input, shape index: {}]   ;;  %s1409_s6 = inlined_call_operand.vmem [shape: f32[1,8], index: 6, kind: input, shape index: {}]   ;;  %s1410_s9 = inlined_call_operand.vmem [shape: f32[32,128], index: 9, kind: output, shape index: {}]  }
   0x1   :  { %v843_v0 = vld [vmem:[%s1401_s1 + $0x78] sm:$0xff]  ;;  %v842_v3 = vld [vmem:[%s1401_s1 + $0x70] sm:$0xff]  ;;  %v841_v6 = vld [vmem:[%s1401_s1 + $0x68] sm:$0xff] }
   0x2   :  { %v41_v1 = vld [vmem:[%s1401_s1 + $0x38] sm:$0xff]  ;;  %68 = vmatpush.msra.mxu0 %v843_v0  ;;  %v40_v4 = vld [vmem:[%s1401_s1 + $0x30] sm:$0xff]  ;;  %v39_v7 = vld [vmem:[%s1401_s1 + $0x28] sm:$0xff]  ;;  %175 = vmatpush.msra.mxu3 %v843_v0 }
   0x3   :  { %v855_v2 = vld [vmem:[%s1401_s1 + $0xb8] sm:$0xff]  ;;  %97 = vmatpush.msra.mxu1 %v41_v1  ;;  %v854_v5 = vld [vmem:[%s1401_s1 + $0xb0] sm:$0xff]  ;;  %v853_v8 = vld [vmem:[%s1401_s1 + $0xa8] sm:$0xff] }
   0x4   :  { %137 = vmatpush.msra.mxu2 %v855_v2  ;;  %69 = vmatpush.msra.mxu0 %v842_v3  ;;  %v840_v9 = vld [vmem:[%s1401_s1 + $0x60] sm:$0xff]  ;;  %v839_v12 = vld [vmem:[%s1401_s1 + $0x58] sm:$0xff]  ;;  %v838_v15 = vld [vmem:[%s1401_s1 + $0x50] sm:$0xff] }
   0x5   :  { %98 = vmatpush.msra.mxu1 %v40_v4  ;;  %v38_v10 = vld [vmem:[%s1401_s1 + $0x20] sm:$0xff]  ;;  %176 = vmatpush.msra.mxu3 %v842_v3  ;;  %v37_v13 = vld [vmem:[%s1401_s1 + $0x18] sm:$0xff]  ;;  %v36_v16 = vld [vmem:[%s1401_s1 + $0x10] sm:$0xff] }
   0x6   :  { %138 = vmatpush.msra.mxu2 %v854_v5  ;;  %70 = vmatpush.msra.mxu0 %v841_v6  ;;  %v852_v11 = vld [vmem:[%s1401_s1 + $0xa0] sm:$0xff]  ;;  %v851_v14 = vld [vmem:[%s1401_s1 + $0x98] sm:$0xff]  ;;  %v850_v17 = vld [vmem:[%s1401_s1 + $0x90] sm:$0xff] }
   0x7   :  { %99 = vmatpush.msra.mxu1 %v39_v7  ;;  %177 = vmatpush.msra.mxu3 %v841_v6  ;;  %v837_v18 = vld [vmem:[%s1401_s1 + $0x48] sm:$0xff]  ;;  %v836_v21 = vld [vmem:[%s1401_s1 + $0x40] sm:$0xff]  ;;  %v858_v32 = vld [vmem:[%s1402_s0 + $0x18] sm:$0xff] }
   0x8   :  { %139 = vmatpush.msra.mxu2 %v853_v8  ;;  %71 = vmatpush.msra.mxu0 %v840_v9  ;;  %v35_v19 = vld [vmem:[%s1401_s1 + $0x8] sm:$0xff]  ;;  %v34_v22 = vld [vmem:[%s1401_s1] sm:$0xff] }
   0x9   :  { %100 = vmatpush.msra.mxu1 %v38_v10  ;;  %178 = vmatpush.msra.mxu3 %v840_v9  ;;  %v849_v20 = vld [vmem:[%s1401_s1 + $0x88] sm:$0xff]  ;;  %v848_v23 = vld [vmem:[%s1401_s1 + $0x80] sm:$0xff] }
   0xa   :  { %140 = vmatpush.msra.mxu2 %v852_v11  ;;  %72 = vmatpush.msra.mxu0 %v839_v12  ;;  %v42_v24 = vld [vmem:[%s1402_s0 + $0x1] sm:$0xff]  ;;  %v860_v27 = vld [vmem:[%s1402_s0 + $0x19] sm:$0xff]  ;;  %v43_v28 = vld [vmem:[%s1402_s0 + $0x9] sm:$0xff] }
   0xb   :  { %101 = vmatpush.msra.mxu1 %v37_v13  ;;  %179 = vmatpush.msra.mxu3 %v839_v12  ;;  %v32_v25 = vld [vmem:[%s1402_s0] sm:$0xff]  ;;  %v33_v29 = vld [vmem:[%s1402_s0 + $0x8] sm:$0xff] }
   0xc   :  { %141 = vmatpush.msra.mxu2 %v851_v14  ;;  %73 = vmatpush.msra.mxu0 %v838_v15  ;;  %v112_v26 = vld [vmem:[%s1402_s0 + $0x2] sm:$0xff]  ;;  %v113_v30 = vld [vmem:[%s1402_s0 + $0xa] sm:$0xff]  ;;  %v866_v33 = vld [vmem:[%s1402_s0 + $0x1a] sm:$0xff] }
   0xd   :  { %102 = vmatpush.msra.mxu1 %v36_v16  ;;  %180 = vmatpush.msra.mxu3 %v838_v15  ;;  %v861_v31 = vld [vmem:[%s1402_s0 + $0x21] sm:$0xff] }
   0xe   :  { %142 = vmatpush.msra.mxu2 %v850_v17  ;;  %74 = vmatpush.msra.mxu0 %v837_v18  ;;  %v859_v34 = vld [vmem:[%s1402_s0 + $0x20] sm:$0xff] }
   0xf   :  { %103 = vmatpush.msra.mxu1 %v35_v19  ;;  %181 = vmatpush.msra.mxu3 %v837_v18  ;;  %v867_v35 = vld [vmem:[%s1402_s0 + $0x22] sm:$0xff] }
  0x10   :  { %143 = vmatpush.msra.mxu2 %v849_v20  ;;  %75 = vmatpush.msra.mxu0 %v836_v21  ;;  %v256_v38 = vld [vmem:[%s1403_s7] sm:$0xff] }
  0x11   :  { %104 = vmatpush.msra.mxu1 %v34_v22  ;;  %844 = vmatmul.msk.f32.vlgmr.msra.gmra.mxu0 %vm53_vm0, %v42_v24 }
  0x12   :  { %144 = vmatpush.msra.mxu2 %v848_v23  ;;  %846 = vmatmul.msk.f32.vlgmr.msra.gmra.mxu1 %vm53_vm0, %v32_v25 }
  0x13   :  { %856 = vmatmul.msk.f32.vlgmr.msra.gmra.mxu2 %vm53_vm0, %v112_v26  ;;  %204 = vmatpush.msrb.mxu0 %v41_v1 }
  0x14   :  { %235 = vmatpush.msrb.mxu1 %v855_v2  ;;  %182 = vmatpush.msra.mxu3 %v836_v21 }
  0x15   :  { %205 = vmatpush.msrb.mxu0 %v40_v4  ;;  %862 = vmatmul.msk.f32.vlgmr.msra.gmra.mxu3 %vm53_vm0, %v860_v27 }
  0x16   :  { %236 = vmatpush.msrb.mxu1 %v854_v5  ;;  %287 = vmatpush.xpose.msrb.mxu2 %v256_v38 }
  0x17   :  { %206 = vmatpush.msrb.mxu0 %v39_v7  ;;  %312 = vmatpush.msrb.mxu3 %v256_v38 }
  0x18   :  { %237 = vmatpush.msrb.mxu1 %v853_v8 }
  0x19   :  { %207 = vmatpush.msrb.mxu0 %v38_v10  ;;  %394 = vmatpush.msra.mxu3 %v256_v38 }
  0x1a   :  { %238 = vmatpush.msrb.mxu1 %v852_v11  ;;  %845 = vmatmul.msk.f32.gmra.mxu0 %vm53_vm0, %v43_v28 }
  0x1b   :  { %847 = vmatmul.msk.f32.gmra.mxu1 %vm53_vm0, %v33_v29  ;;  %857 = vmatmul.msk.f32.gmra.mxu2 %vm53_vm0, %v113_v30 }
  0x1c   :  { %208 = vmatpush.msrb.mxu0 %v37_v13  ;;  %239 = vmatpush.msrb.mxu1 %v851_v14 }
  0x1d   :  { %863 = vmatmul.msk.f32.gmra.mxu3 %vm53_vm0, %v861_v31  ;;  %356 = vmatpush.xpose.msra.mxu2 %v256_v38 }
  0x1e   :  { %209 = vmatpush.msrb.mxu0 %v36_v16  ;;  %240 = vmatpush.msrb.mxu1 %v850_v17 }
  0x20   :  { %210 = vmatpush.msrb.mxu0 %v35_v19  ;;  %241 = vmatpush.msrb.mxu1 %v849_v20 }
  0x22   :  { %211 = vmatpush.msrb.mxu0 %v34_v22  ;;  %242 = vmatpush.msrb.mxu1 %v848_v23 }
  0x23   :  { %864 = vmatmul.msk.f32.vlgmr.msrb.gmra.mxu0 %vm53_vm0, %v858_v32  ;;  %868 = vmatmul.msk.f32.vlgmr.msrb.gmra.mxu1 %vm53_vm0, %v866_v33 }
  0x24   :  { %417 = vmatpush.msra.mxu0 %v256_v38 }
  0x2b   :  { %865 = vmatmul.msk.f32.gmra.mxu0 %vm53_vm0, %v859_v34  ;;  %869 = vmatmul.msk.f32.gmra.mxu1 %vm53_vm0, %v867_v35 }
  0x8e   :  { %v77_v36 = vpop.f32.mrf.mxu0 }
  0x8f   :  { %v106_v37 = vpop.f32.mrf.mxu1 }
  0x90   :  { %v107_v42 = vadd.f32 %v106_v37, %v77_v36 }
  0x96   :  { %v146_v39 = vpop.f32.mrf.mxu2 }
  0x97   :  { %v80_v40 = vpop.f32.mrf.mxu0  ;;  %v152_v44 = vadd.f32 %v146_v39, %v107_v42  ;;  %v888_v39 = vld [vmem:[%s1404_s2 + $0xf8] sm:$0xff]  ;;  %v1122_v42 = vld [vmem:[%s1404_s2 + $0x70] sm:$0xff] }
  0x98   :  { %v109_v41 = vpop.f32.mrf.mxu1  ;;  %v184_v43 = vpop.f32.mrf.mxu3  ;;  %480 = vmatpush.msra.mxu1 %v888_v39  ;;  %576 = vmatpush.msrb.mxu0 %v888_v39  ;;  %v892_v39 = vld [vmem:[%s1404_s2 + $0x118] sm:$0xff] }
  0x99   :  { %v110_v45 = vadd.f32 %v109_v41, %v80_v40  ;;  %v1087_v50 = vmax.f32 %v152_v44, 0.0  ;;  %v1113_v40 = vld [vmem:[%s1404_s2 + $0x78] sm:$0xff]  ;;  %v887_v41 = vld [vmem:[%s1404_s2 + $0xf0] sm:$0xff]  ;;  %v1130_v44 = vld [vmem:[%s1404_s2 + $0x68] sm:$0xff] }
  0x9a   :  { %481 = vmatpush.msra.mxu1 %v887_v41  ;;  %577 = vmatpush.msrb.mxu0 %v887_v41  ;;  %v890_v41 = vld [vmem:[%s1404_s2 + $0x108] sm:$0xff] }
  0x9e   :  { %v149_v46 = vpop.f32.mrf.mxu2 }
  0x9f   :  { %v153_v47 = vadd.f32 %v149_v46, %v110_v45 }
  0xa0   :  { %v213_v48 = vpop.f32.mrf.mxu0  ;;  %v244_v49 = vpop.f32.mrf.mxu1 }
  0xa1   :  { %v1089_v51 = vmax.f32 %v153_v47, 0.0  ;;  %v214_v53 = vadd.f32 %v213_v48, %v184_v43  ;;  %v187_v54 = vpop.f32.mrf.mxu3  ;;  %v886_v43 = vld [vmem:[%s1404_s2 + $0xe8] sm:$0xff]  ;;  %v885_v47 = vld [vmem:[%s1404_s2 + $0xe0] sm:$0xff] }
  0xa2   :  { %v1139_v48 = vld [vmem:[%s1404_s2 + $0x60] sm:$0xff]  ;;  %482 = vmatpush.msra.mxu1 %v886_v43  ;;  %578 = vmatpush.msrb.mxu0 %v886_v43 }
  0xa3   :  { %v257_v52 = vadd.f32 %v1089_v51, %v1087_v50  ;;  %v250_v57 = vadd.f32 %v244_v49, %v214_v53  ;;  %v1145_v49 = vld [vmem:[%s1404_s2 + $0x178] sm:$0xff] }
  0xa4   :  { %v884_v53 = vld [vmem:[%s1404_s2 + $0xd8] sm:$0xff]  ;;  %483 = vmatpush.msra.mxu1 %v885_v47  ;;  %579 = vmatpush.msrb.mxu0 %v885_v47 }
  0xa5   :  { %v258_v55 = vrot.slane %v257_v52, 4  ;;  %v1093_v62 = vmax.f32 %v250_v57, 0.0  ;;  %v883_v57 = vld [vmem:[%s1404_s2 + $0xd0] sm:$0xff] }
  0xa6   :  { %484 = vmatpush.msra.mxu1 %v884_v53  ;;  %580 = vmatpush.msrb.mxu0 %v884_v53 }
  0xa7   :  { %v259_v60 = vadd.f32 %v258_v55, %v257_v52  ;;  %v1161_v55 = vld [vmem:[%s1404_s2 + $0x170] sm:$0xff] }
  0xa8   :  { %v216_v56 = vpop.f32.mrf.mxu0  ;;  %v247_v59 = vpop.f32.mrf.mxu1  ;;  %485 = vmatpush.msra.mxu1 %v883_v57  ;;  %581 = vmatpush.msrb.mxu0 %v883_v57 }
  0xa9   :  { %v217_v58 = vadd.f32 %v216_v56, %v187_v54  ;;  %v260_v0 = vrot.slane %v259_v60, 2  ;;  %v1155_v54 = vld [vmem:[%s1404_s2 + $0x58] sm:$0xff]  ;;  %v1167_v56 = vld [vmem:[%s1404_s2 + $0x168] sm:$0xff] }
  0xab   :  { %v251_v61 = vadd.f32 %v247_v59, %v217_v58  ;;  %v261_v4 = vadd.f32 %v260_v0, %v259_v60  ;;  %v1176_v58 = vld [vmem:[%s1404_s2 + $0x50] sm:$0xff]  ;;  %v1183_v59 = vld [vmem:[%s1404_s2 + $0x160] sm:$0xff]  ;;  %v882_v60 = vld [vmem:[%s1404_s2 + $0xc8] sm:$0xff] }
  0xac   :  { %v1198_v0 = vld [vmem:[%s1404_s2 + $0x158] sm:$0xff]  ;;  %486 = vmatpush.msra.mxu1 %v882_v60  ;;  %582 = vmatpush.msrb.mxu0 %v882_v60 }
  0xad   :  { %v1095_v63 = vmax.f32 %v251_v61, 0.0  ;;  %v262_v6 = vrot.slane %v261_v4, 1  ;;  %v1191_v61 = vld [vmem:[%s1404_s2 + $0x48] sm:$0xff] }
  0xaf   :  { %v264_v1 = vadd.f32 %v1095_v63, %v1093_v62  ;;  %v263_v9 = vadd.f32 %v262_v6, %v261_v4  ;;  %v1221_v6 = vld [vmem:[%s1404_s2 + $0x38] sm:$0xff] }
  0xb1   :  { %v265_v2 = vrot.slane %v264_v1, 4 }
  0xb3   :  { %v266_v3 = vadd.f32 %v265_v2, %v264_v1  ;;  %v881_v1 = vld [vmem:[%s1404_s2 + $0xc0] sm:$0xff] }
  0xb4   :  { %v1206_v2 = vld [vmem:[%s1404_s2 + $0x40] sm:$0xff]  ;;  %487 = vmatpush.msra.mxu1 %v881_v1  ;;  %583 = vmatpush.msrb.mxu0 %v881_v1 }
  0xb5   :  { %v267_v5 = vrot.slane %v266_v3, 2 }
  0xb7   :  { %v268_v7 = vadd.f32 %v267_v5, %v266_v3  ;;  %v1213_v3 = vld [vmem:[%s1404_s2 + $0x150] sm:$0xff]  ;;  %v880_v5 = vld [vmem:[%s1404_s2 + $0xb8] sm:$0xff] }
  0xb8   :  { %488 = vmatpush.msra.mxu1 %v880_v5  ;;  %584 = vmatpush.msrb.mxu0 %v880_v5 }
  0xb9   :  { %v269_v8 = vrot.slane %v268_v7, 1 }
  0xbb   :  { %v270_v10 = vadd.f32 %v269_v8, %v268_v7  ;;  %v1229_v8 = vld [vmem:[%s1404_s2 + $0x148] sm:$0xff] }
  0xbd   :  { %v271_v11 = vadd.f32 %v270_v10, %v263_v9  ;;  %v879_v9 = vld [vmem:[%s1404_s2 + $0xb0] sm:$0xff] }
  0xbe   :  { %v1237_v10 = vld [vmem:[%s1404_s2 + $0x30] sm:$0xff]  ;;  %489 = vmatpush.msra.mxu1 %v879_v9  ;;  %585 = vmatpush.msrb.mxu0 %v879_v9 }
  0xbf   :  { %288 = vmatmul.f32.vlgmr.msrb.gmra.mxu2 %v271_v11 }
  0xc0   :  { %503 = vmatpush.msrb.mxu2 %v1113_v40 }
  0xc2   :  { %504 = vmatpush.msrb.mxu2 %v1122_v42 }
  0xc4   :  { %505 = vmatpush.msrb.mxu2 %v1130_v44 }
  0xc6   :  { %506 = vmatpush.msrb.mxu2 %v1139_v48 }
  0xc8   :  { %507 = vmatpush.msrb.mxu2 %v1155_v54 }
  0xca   :  { %508 = vmatpush.msrb.mxu2 %v1176_v58 }
  0xcc   :  { %509 = vmatpush.msrb.mxu2 %v1191_v61 }
  0xce   :  { %510 = vmatpush.msrb.mxu2 %v1206_v2 }
  0xd0   :  { %511 = vmatpush.msrb.mxu2 %v1221_v6 }
  0xd2   :  { %512 = vmatpush.msrb.mxu2 %v1237_v10 }
 0x142   :  { %v289_v12 = vpop.f32.mrf.mxu2 }
 0x143   :  { %v1099_v13 = vmul.f32 0.001953125, %v289_v12  ;;  %v878_v12 = vld [vmem:[%s1404_s2 + $0xa8] sm:$0xff] }
 0x144   :  { %490 = vmatpush.msra.mxu1 %v878_v12  ;;  %586 = vmatpush.msrb.mxu0 %v878_v12 }
 0x145   :  { %870 = vmatmul.msk.f32.vlgmr.msrb.gmra.mxu3 %vm293_vm1, %v1099_v13 }
 0x146   :  { %545 = vmatpush.msrb.mxu3 %v1145_v49 }
 0x148   :  { %546 = vmatpush.msrb.mxu3 %v1161_v55 }
 0x14a   :  { %547 = vmatpush.msrb.mxu3 %v1167_v56 }
 0x14c   :  { %548 = vmatpush.msrb.mxu3 %v1183_v59 }
 0x14e   :  { %549 = vmatpush.msrb.mxu3 %v1198_v0 }
 0x150   :  { %550 = vmatpush.msrb.mxu3 %v1213_v3 }
 0x152   :  { %551 = vmatpush.msrb.mxu3 %v1229_v8 }
 0x1c8   :  { %v314_v14 = vpop.f32.mrf.mxu3 }
 0x1c9   :  { %v317_v15 = vperm.slane %v314_v14, 0  ;;  %v1247_v14 = vld [vmem:[%s1404_s2 + $0x28] sm:$0xff] }
 0x1ca   :  { %513 = vmatpush.msrb.mxu2 %v1247_v14 }
 0x1cb   :  { %v318_v16 = vsub.f32 %v1087_v50, %v317_v15  ;;  %v319_v17 = vsub.f32 %v1089_v51, %v317_v15  ;;  %v329_v18 = vsub.f32 %v1093_v62, %v317_v15  ;;  %v330_v19 = vsub.f32 %v1095_v63, %v317_v15 }
 0x1cd   :  { %v320_v20 = vmul.f32 %v318_v16, %v318_v16  ;;  %v321_v21 = vmul.f32 %v319_v17, %v319_v17  ;;  %v331_v22 = vmul.f32 %v329_v18, %v329_v18  ;;  %v332_v23 = vmul.f32 %v330_v19, %v330_v19  ;;  %v877_v16 = vld [vmem:[%s1404_s2 + $0xa0] sm:$0xff]  ;;  %v876_v19 = vld [vmem:[%s1404_s2 + $0x98] sm:$0xff] }
 0x1ce   :  { %v1257_v17 = vld [vmem:[%s1404_s2 + $0x20] sm:$0xff]  ;;  %491 = vmatpush.msra.mxu1 %v877_v16  ;;  %587 = vmatpush.msrb.mxu0 %v877_v16 }
 0x1cf   :  { %v322_v24 = vadd.f32 %v321_v21, %v320_v20  ;;  %v333_v25 = vadd.f32 %v332_v23, %v331_v22  ;;  %v1266_v20 = vld [vmem:[%s1404_s2 + $0x18] sm:$0xff]  ;;  %v254_v21 = vld [vmem:[%s1405_s3] sm:$0x1]  ;;  %514 = vmatpush.msrb.mxu2 %v1257_v17  ;;  %v875_v23 = vld [vmem:[%s1404_s2 + $0x90] sm:$0xff] }
 0x1d0   :  { %492 = vmatpush.msra.mxu1 %v876_v19  ;;  %588 = vmatpush.msrb.mxu0 %v876_v19 }
 0x1d1   :  { %v323_v26 = vrot.slane %v322_v24, 4  ;;  %v334_v27 = vrot.slane %v333_v25, 4  ;;  %515 = vmatpush.msrb.mxu2 %v1266_v20 }
 0x1d2   :  { %493 = vmatpush.msra.mxu1 %v875_v23  ;;  %589 = vmatpush.msrb.mxu0 %v875_v23 }
 0x1d3   :  { %v324_v28 = vadd.f32 %v323_v26, %v322_v24  ;;  %v335_v29 = vadd.f32 %v334_v27, %v333_v25  ;;  %v1279_v24 = vld [vmem:[%s1404_s2 + $0x10] sm:$0xff]  ;;  %v874_v27 = vld [vmem:[%s1404_s2 + $0x88] sm:$0xff] }
 0x1d4   :  { %516 = vmatpush.msrb.mxu2 %v1279_v24  ;;  %494 = vmatpush.msra.mxu1 %v874_v27 }
 0x1d5   :  { %v325_v30 = vrot.slane %v324_v28, 2  ;;  %v336_v31 = vrot.slane %v335_v29, 2  ;;  %590 = vmatpush.msrb.mxu0 %v874_v27 }
 0x1d7   :  { %v326_v32 = vadd.f32 %v325_v30, %v324_v28  ;;  %v337_v33 = vadd.f32 %v336_v31, %v335_v29  ;;  %v1288_v28 = vld [vmem:[%s1404_s2 + $0x8] sm:$0xff]  ;;  %v255_v29 = vld [vmem:[%s1406_s4] sm:$0x1] }
 0x1d8   :  { %517 = vmatpush.msrb.mxu2 %v1288_v28 }
 0x1d9   :  { %v327_v34 = vrot.slane %v326_v32, 1  ;;  %v338_v35 = vrot.slane %v337_v33, 1 }
 0x1db   :  { %v328_v36 = vadd.f32 %v327_v34, %v326_v32  ;;  %v339_v37 = vadd.f32 %v338_v35, %v337_v33  ;;  %v873_v32 = vld [vmem:[%s1404_s2 + $0x80] sm:$0xff]  ;;  %v913_v34 = vmov 0.0   ;;  %v896_v35 = vld [vmem:[%s1404_s2 + $0x138] sm:$0xff] }
 0x1dc   :  { %495 = vmatpush.msra.mxu1 %v873_v32  ;;  %591 = vmatpush.msrb.mxu0 %v873_v32  ;;  %v445_v33 = vld [vmem:[%s1404_s2] sm:$0xff]  ;;  %422 = vst [vmem:[#allocation2] sm:$0xff] %v913_v34 }
 0x1dd   :  { %v340_v38 = vadd.f32 %v339_v37, %v328_v36  ;;  %518 = vmatpush.msrb.mxu2 %v445_v33  ;;  %423 = vst [vmem:[#allocation2 + $0x8] sm:$0xff] %v913_v34  ;;  %v895_v36 = vld [vmem:[%s1404_s2 + $0x130] sm:$0xff]  ;;  %v894_v37 = vld [vmem:[%s1404_s2 + $0x128] sm:$0xff] }
 0x1de   :  { %599 = vmatpush.msrb.mxu1 %v1113_v40  ;;  %424 = vst [vmem:[#allocation2 + $0x10] sm:$0x3] %v913_v34  ;;  %v891_v40 = vld [vmem:[%s1404_s2 + $0x110] sm:$0xff] }
 0x1df   :  { %357 = vmatmul.f32.vlgmr.msra.gmra.mxu2 %v340_v38  ;;  %425 = vst [vmem:[#allocation2 + $0x18] sm:$0xff] %v913_v34  ;;  %v893_v38 = vld [vmem:[%s1404_s2 + $0x120] sm:$0xff] }
 0x1e0   :  { %600 = vmatpush.msrb.mxu1 %v1122_v42  ;;  %624 = vmatpush.msra.mxu2 %v1145_v49  ;;  %426 = vst [vmem:[#allocation2 + $0x20] sm:$0xff] %v913_v34  ;;  %v889_v42 = vld [vmem:[%s1404_s2 + $0x100] sm:$0xff] }
 0x1e1   :  { %427 = vst [vmem:[#allocation2 + $0x28] sm:$0x3] %v913_v34 }
 0x1e2   :  { %601 = vmatpush.msrb.mxu1 %v1130_v44  ;;  %625 = vmatpush.msra.mxu2 %v1161_v55 }
 0x1e4   :  { %602 = vmatpush.msrb.mxu1 %v1139_v48  ;;  %626 = vmatpush.msra.mxu2 %v1167_v56 }
 0x1e6   :  { %603 = vmatpush.msrb.mxu1 %v1155_v54  ;;  %627 = vmatpush.msra.mxu2 %v1183_v59 }
 0x1e8   :  { %604 = vmatpush.msrb.mxu1 %v1176_v58  ;;  %628 = vmatpush.msra.mxu2 %v1198_v0 }
 0x1ea   :  { %605 = vmatpush.msrb.mxu1 %v1191_v61  ;;  %629 = vmatpush.msra.mxu2 %v1213_v3  ;;  %v653_v3 = vld [vmem:[%s1407_s8] sm:$0xff] }
 0x1ec   :  { %606 = vmatpush.msrb.mxu1 %v1206_v2  ;;  %630 = vmatpush.msra.mxu2 %v1229_v8 }
 0x1ee   :  { %607 = vmatpush.msrb.mxu1 %v1221_v6 }
 0x1f0   :  { %608 = vmatpush.msrb.mxu1 %v1237_v10 }
 0x1f2   :  { %609 = vmatpush.msrb.mxu1 %v1247_v14 }
 0x1f4   :  { %610 = vmatpush.msrb.mxu1 %v1257_v17 }
 0x1f6   :  { %611 = vmatpush.msrb.mxu1 %v1266_v20 }
 0x1f8   :  { %612 = vmatpush.msrb.mxu1 %v1279_v24 }
 0x1fa   :  { %613 = vmatpush.msrb.mxu1 %v1288_v28 }
 0x1fc   :  { %614 = vmatpush.msrb.mxu1 %v445_v33 }
 0x262   :  { %v358_v45 = vpop.f32.mrf.mxu2 }
 0x263   :  { %v361_v46 = vmul.f32 0.001953125, %v358_v45 }
 0x265   :  { %v1147_v52 = vadd.f32 1e-05, %v361_v46 }
 0x267   :  { %909 = vrsqrt.f32 %v1147_v52  ;;  %vm369_vm3 = vweird.f32 %v1147_v52 }
 0x26d   :  { %v910_v4 = vpop.eup %909 }
 0x26e   :  { %v364_v7 = vmul.f32 %v910_v4, %v1147_v52  ;;  %vm370_vm2 = vweird.f32 %v910_v4 }
 0x26f   :  { %vm371_vm4 = vmor %vm369_vm3, %vm370_vm2 }
 0x270   :  { %v365_v11 = vmul.f32 %v910_v4, %v364_v7 }
 0x272   :  { %v366_v15 = vmul.f32 0.5, %v365_v11 }
 0x274   :  { %v367_v18 = vsub.f32 1.5, %v366_v15 }
 0x276   :  { %v368_v22 = vmul.f32 %v910_v4, %v367_v18 }
 0x278   :  { %v372_v25 = vsel %vm371_vm4, %v910_v4, %v368_v22 }
 0x279   :  { %v373_v26 = vmul.f32 %v372_v25, %v254_v21 }
 0x27b   :  { %v374_v30 = vmul.f32 %v373_v26, %v1099_v13  ;;  %871 = vmatmul.msk.f32.vlgmr.msra.gmra.mxu3 %vm293_vm1, %v373_v26  ;;  %v897_v13 = vld [vmem:[%s1404_s2 + $0x140] sm:$0xff] }
 0x27c   :  { %552 = vmatpush.msrb.mxu3 %v897_v13  ;;  %631 = vmatpush.msra.mxu2 %v897_v13 }
 0x27d   :  { %v375_v31 = vsub.f32 %v255_v29, %v374_v30 }
 0x27e   :  { %553 = vmatpush.msrb.mxu3 %v896_v35  ;;  %632 = vmatpush.msra.mxu2 %v896_v35 }
 0x27f   :  { %872 = vmatmul.msk.f32.vlgmr.msra.gmra.mxu0 %vm293_vm1, %v375_v31 }
 0x280   :  { %554 = vmatpush.msrb.mxu3 %v895_v36  ;;  %633 = vmatpush.msra.mxu2 %v895_v36 }
 0x281   :  { %708 = vmatpush.msra.mxu0 %v653_v3 }
 0x282   :  { %555 = vmatpush.msrb.mxu3 %v894_v37  ;;  %634 = vmatpush.msra.mxu2 %v894_v37 }
 0x284   :  { %556 = vmatpush.msrb.mxu3 %v893_v38  ;;  %635 = vmatpush.msra.mxu2 %v893_v38 }
 0x286   :  { %557 = vmatpush.msrb.mxu3 %v892_v39  ;;  %636 = vmatpush.msra.mxu2 %v892_v39 }
 0x288   :  { %558 = vmatpush.msrb.mxu3 %v891_v40  ;;  %637 = vmatpush.msra.mxu2 %v891_v40 }
 0x28a   :  { %559 = vmatpush.msrb.mxu3 %v890_v41  ;;  %638 = vmatpush.msra.mxu2 %v890_v41 }
 0x28c   :  { %560 = vmatpush.msrb.mxu3 %v889_v42  ;;  %639 = vmatpush.msra.mxu2 %v889_v42 }
 0x28e   :  { %684 = vmatpush.xpose.msra.mxu3 %v653_v3 }
 0x2fc   :  { %v419_v43 = vpop.f32.mrf.mxu0 }
 0x2fd   :  { %v431_v46 = vperm.slane %v419_v43, 0 }
 0x2fe   :  { %v396_v44 = vpop.f32.mrf.mxu3 }
 0x2ff   :  { %v428_v45 = vperm.slane %v396_v44, 0 }
 0x301   :  { %v429_v47 = vmul.f32 %v428_v45, %v1087_v50  ;;  %v430_v48 = vmul.f32 %v428_v45, %v1089_v51  ;;  %v436_v49 = vmul.f32 %v428_v45, %v1093_v62  ;;  %v437_v52 = vmul.f32 %v428_v45, %v1095_v63 }
 0x303   :  { %v432_v53 = vadd.f32 %v431_v46, %v429_v47  ;;  %v433_v54 = vadd.f32 %v431_v46, %v430_v48  ;;  %v438_v55 = vadd.f32 %v436_v49, %v431_v46  ;;  %v439_v56 = vadd.f32 %v437_v52, %v431_v46 }
 0x305   :  { %434 = vst [vmem:[#allocation2 + $0x1] sm:$0xff] %v432_v53  ;;  %496 = vmatmul.f32.vlgmr.msra.gmra.mxu1 %v432_v53  ;;  %592 = vmatmul.f32.vlgmr.msrb.gmra.mxu0 %v438_v55 }
 0x306   :  { %435 = vst [vmem:[#allocation2 + $0x9] sm:$0xff] %v433_v54  ;;  %790 = vmatpush.msrb.mxu0 %v653_v3 }
 0x307   :  { %441 = vst [vmem:[#allocation2 + $0x19] sm:$0xff] %v438_v55 }
 0x308   :  { %442 = vst [vmem:[#allocation2 + $0x21] sm:$0xff] %v439_v56 }
 0x30c   :  { %v443_v57 = vld [vmem:[#allocation2] sm:$0xff] }
 0x30d   :  { %519 = vmatmul.f32.vlgmr.msrb.gmra.mxu2 %v443_v57  ;;  %v526_v58 = vld [vmem:[#allocation2 + $0x2] sm:$0xff]  ;;  %499 = vmatmul.f32.gmra.mxu1 %v433_v54  ;;  %v527_v62 = vld [vmem:[#allocation2 + $0xa] sm:$0xff] }
 0x30e   :  { %561 = vmatmul.f32.vlgmr.msrb.gmra.mxu3 %v526_v58  ;;  %595 = vmatmul.f32.gmra.mxu0 %v439_v56  ;;  %v444_v50 = vld [vmem:[#allocation2 + $0x8] sm:$0xff]  ;;  %v572_v51 = vld [vmem:[#allocation2 + $0x18] sm:$0xff] }
 0x30f   :  { %v622_v63 = vld [vmem:[#allocation2 + $0x1a] sm:$0xff]  ;;  %v623_v60 = vld [vmem:[#allocation2 + $0x22] sm:$0xff]  ;;  %752 = vmatpush.xpose.msrb.mxu3 %v653_v3 }
 0x310   :  { %v573_v59 = vld [vmem:[#allocation2 + $0x20] sm:$0xff] }
 0x315   :  { %522 = vmatmul.f32.gmra.mxu2 %v444_v50  ;;  %615 = vmatmul.f32.vlgmr.msrb.gmra.mxu1 %v572_v51 }
 0x316   :  { %564 = vmatmul.f32.gmra.mxu3 %v527_v62 }
 0x31d   :  { %640 = vmatmul.f32.vlgmr.msra.gmra.mxu2 %v622_v63  ;;  %618 = vmatmul.f32.gmra.mxu1 %v573_v59 }
 0x325   :  { %643 = vmatmul.f32.gmra.mxu2 %v623_v60 }
 0x382   :  { %v497_v61 = vpop.f32.mrf.mxu1  ;;  %v593_v11 = vpop.f32.mrf.mxu0 }
 0x38a   :  { %v500_v1 = vpop.f32.mrf.mxu1 }
 0x38b   :  { %v596_v20 = vpop.f32.mrf.mxu0 }
 0x390   :  { %v520_v0 = vpop.f32.mrf.mxu2 }
 0x391   :  { %v562_v2 = vpop.f32.mrf.mxu3  ;;  %v521_v4 = vadd.f32 %v520_v0, %v497_v61 }
 0x392   :  { %v616_v8 = vpop.f32.mrf.mxu1 }
 0x393   :  { %v568_v9 = vadd.f32 %v562_v2, %v521_v4  ;;  %v617_v19 = vadd.f32 %v616_v8, %v593_v11 }
 0x395   :  { %v1362_v14 = vmax.f32 %v568_v9, 0.0 }
 0x398   :  { %v523_v5 = vpop.f32.mrf.mxu2 }
 0x399   :  { %v524_v6 = vadd.f32 %v523_v5, %v500_v1  ;;  %v565_v7 = vpop.f32.mrf.mxu3 }
 0x39a   :  { %v619_v17 = vpop.f32.mrf.mxu1 }
 0x39b   :  { %v569_v10 = vadd.f32 %v565_v7, %v524_v6  ;;  %v620_v22 = vadd.f32 %v619_v17, %v596_v20  ;;  %v652_v17 = vld [vmem:[%s1409_s6] sm:$0x1] }
 0x39d   :  { %v1360_v12 = vmax.f32 %v569_v10, 0.0  ;;  %v651_v10 = vld [vmem:[%s1408_s5] sm:$0x1] }
 0x39f   :  { %v654_v16 = vadd.f32 %v1360_v12, %v1362_v14 }
 0x3a0   :  { %v641_v15 = vpop.f32.mrf.mxu2 }
 0x3a1   :  { %v655_v18 = vrot.slane %v654_v16, 4  ;;  %v647_v21 = vadd.f32 %v641_v15, %v617_v19 }
 0x3a3   :  { %v656_v24 = vadd.f32 %v655_v18, %v654_v16  ;;  %v1366_v26 = vmax.f32 %v647_v21, 0.0 }
 0x3a5   :  { %v657_v28 = vrot.slane %v656_v24, 2 }
 0x3a7   :  { %v658_v31 = vadd.f32 %v657_v28, %v656_v24 }
 0x3a8   :  { %v644_v23 = vpop.f32.mrf.mxu2 }
 0x3a9   :  { %v648_v25 = vadd.f32 %v644_v23, %v620_v22  ;;  %v659_v34 = vrot.slane %v658_v31, 1 }
 0x3ab   :  { %v1368_v27 = vmax.f32 %v648_v25, 0.0  ;;  %v660_v36 = vadd.f32 %v659_v34, %v658_v31 }
 0x3ad   :  { %v661_v29 = vadd.f32 %v1368_v27, %v1366_v26 }
 0x3af   :  { %v662_v30 = vrot.slane %v661_v29, 4 }
 0x3b1   :  { %v663_v32 = vadd.f32 %v662_v30, %v661_v29 }
 0x3b3   :  { %v664_v13 = vrot.slane %v663_v32, 2 }
 0x3b5   :  { %v665_v33 = vadd.f32 %v664_v13, %v663_v32 }
 0x3b7   :  { %v666_v35 = vrot.slane %v665_v33, 1 }
 0x3b9   :  { %v667_v37 = vadd.f32 %v666_v35, %v665_v33 }
 0x3bb   :  { %v668_v38 = vadd.f32 %v667_v37, %v660_v36 }
 0x3bd   :  { %685 = vmatmul.f32.vlgmr.msra.gmra.mxu3 %v668_v38 }
 0x3be   :  { %813 = vmatpush.msra.mxu3 %v653_v3 }
 0x440   :  { %v686_v39 = vpop.f32.mrf.mxu3 }
 0x441   :  { %v689_v40 = vmul.f32 0.001953125, %v686_v39 }
 0x443   :  { %905 = vmatmul.msk.f32.vlgmr.msra.gmra.mxu0 %vm293_vm1, %v689_v40 }
 0x4c0   :  { %v710_v41 = vpop.f32.mrf.mxu0 }
 0x4c1   :  { %v713_v42 = vperm.slane %v710_v41, 0 }
 0x4c3   :  { %v714_v43 = vsub.f32 %v1362_v14, %v713_v42  ;;  %v715_v44 = vsub.f32 %v1360_v12, %v713_v42  ;;  %v725_v45 = vsub.f32 %v1366_v26, %v713_v42  ;;  %v726_v46 = vsub.f32 %v1368_v27, %v713_v42 }
 0x4c5   :  { %v716_v47 = vmul.f32 %v714_v43, %v714_v43  ;;  %v717_v48 = vmul.f32 %v715_v44, %v715_v44  ;;  %v727_v49 = vmul.f32 %v725_v45, %v725_v45  ;;  %v728_v52 = vmul.f32 %v726_v46, %v726_v46 }
 0x4c7   :  { %v718_v53 = vadd.f32 %v717_v48, %v716_v47  ;;  %v729_v54 = vadd.f32 %v728_v52, %v727_v49 }
 0x4c9   :  { %v719_v55 = vrot.slane %v718_v53, 4  ;;  %v730_v56 = vrot.slane %v729_v54, 4 }
 0x4cb   :  { %v720_v57 = vadd.f32 %v719_v55, %v718_v53  ;;  %v731_v58 = vadd.f32 %v730_v56, %v729_v54 }
 0x4cd   :  { %v721_v50 = vrot.slane %v720_v57, 2  ;;  %v732_v51 = vrot.slane %v731_v58, 2 }
 0x4cf   :  { %v722_v62 = vadd.f32 %v721_v50, %v720_v57  ;;  %v733_v63 = vadd.f32 %v732_v51, %v731_v58 }
 0x4d1   :  { %v723_v59 = vrot.slane %v722_v62, 1  ;;  %v734_v60 = vrot.slane %v733_v63, 1 }
 0x4d3   :  { %v724_v61 = vadd.f32 %v723_v59, %v722_v62  ;;  %v735_v0 = vadd.f32 %v734_v60, %v733_v63 }
 0x4d5   :  { %v736_v1 = vadd.f32 %v735_v0, %v724_v61 }
 0x4d7   :  { %753 = vmatmul.f32.vlgmr.msrb.gmra.mxu3 %v736_v1 }
 0x55a   :  { %v754_v2 = vpop.f32.mrf.mxu3 }
 0x55b   :  { %v757_v3 = vmul.f32 0.001953125, %v754_v2 }
 0x55d   :  { %v758_v4 = vadd.f32 1e-05, %v757_v3 }
 0x55f   :  { %911 = vrsqrt.f32 %v758_v4  ;;  %vm765_vm6 = vweird.f32 %v758_v4 }
 0x565   :  { %v912_v5 = vpop.eup %911 }
 0x566   :  { %v760_v6 = vmul.f32 %v912_v5, %v758_v4  ;;  %vm766_vm5 = vweird.f32 %v912_v5 }
 0x567   :  { %vm767_vm7 = vmor %vm765_vm6, %vm766_vm5 }
 0x568   :  { %v761_v7 = vmul.f32 %v912_v5, %v760_v6 }
 0x56a   :  { %v762_v8 = vmul.f32 0.5, %v761_v7 }
 0x56c   :  { %v763_v9 = vsub.f32 1.5, %v762_v8 }
 0x56e   :  { %v764_v11 = vmul.f32 %v912_v5, %v763_v9 }
 0x570   :  { %v768_v15 = vsel %vm767_vm7, %v912_v5, %v764_v11 }
 0x571   :  { %v769_v16 = vmul.f32 %v768_v15, %v651_v10 }
 0x573   :  { %v770_v18 = vmul.f32 %v769_v16, %v689_v40  ;;  %906 = vmatmul.msk.f32.vlgmr.msrb.gmra.mxu0 %vm293_vm1, %v769_v16 }
 0x575   :  { %v771_v19 = vsub.f32 %v652_v17, %v770_v18 }
 0x577   :  { %907 = vmatmul.msk.f32.vlgmr.msra.gmra.mxu3 %vm293_vm1, %v771_v19 }
 0x5f0   :  { %v792_v20 = vpop.f32.mrf.mxu0 }
 0x5f1   :  { %v818_v21 = vperm.slane %v792_v20, 0 }
 0x5f3   :  { %v819_v23 = vmul.f32 %v818_v21, %v1362_v14  ;;  %v820_v24 = vmul.f32 %v818_v21, %v1360_v12  ;;  %v826_v25 = vmul.f32 %v818_v21, %v1366_v26  ;;  %v827_v29 = vmul.f32 %v818_v21, %v1368_v27 }
 0x5fa   :  { %v815_v22 = vpop.f32.mrf.mxu3 }
 0x5fb   :  { %v821_v28 = vperm.slane %v815_v22, 0 }
 0x5fd   :  { %v822_v30 = vadd.f32 %v821_v28, %v819_v23  ;;  %v823_v31 = vadd.f32 %v821_v28, %v820_v24  ;;  %v828_v32 = vadd.f32 %v826_v25, %v821_v28  ;;  %v829_v13 = vadd.f32 %v827_v29, %v821_v28 }
 0x5ff   :  { %824 = vst [vmem:[%s1410_s9] sm:$0xff] %v822_v30 }
 0x600   :  { %825 = vst [vmem:[%s1410_s9 + $0x8] sm:$0xff] %v823_v31 }
 0x601   :  { %830 = vst [vmem:[%s1410_s9 + $0x10] sm:$0xff] %v828_v32 }
 0x602   :  { %831 = vst [vmem:[%s1410_s9 + $0x18] sm:$0xff] %v829_v13 }

</bundles_post_ra>
